<compile_context>
chip_gen: v5e
topology: v5e:2x2
jax: 0.10.0
libtpu: 0.0.40
codegen_flags: <defaults>
</compile_context>

<pallas_src>
import functools

import jax
import jax.numpy as jnp
import numpy as np
from jax.experimental import pallas as pl
from jax.experimental.pallas import tpu as pltpu


# ------------------------------- Pallas kernel ------------------------------ #

def _isab_kernel(x_ref, ind_ref, wq_ref, wkv_ref, wo_ref, wl_ref, bkv_ref,
                 vec_ref, o_ref, attn_ref, *, heads, approx_recip):
    """Fused ISAB forward for one batch block.

    x_ref   : (B_blk, N, C)   input set
    ind_ref : (1, M, C)       inducing points (resident)
    wq_ref  : (2, C, C)       Wq per MAB, 1/sqrt(Dh) scale folded in  (compute dtype)
    wkv_ref : (2, C, 2C)      fused [Wk | Wv] per MAB                  (compute dtype)
    wo_ref  : (2, C, C)       output projection per MAB                (compute dtype)
    wl_ref  : (2, C, C)       FFN linear per MAB                       (compute dtype)
    bkv_ref : (2, 1, 2C)      fused [bk | bv] per MAB (f32)
    vec_ref : (2, 7, C)       [bq*scale, bo, bl, ln1g, ln1b, ln2g, ln2b] per MAB (f32)
    attn_ref: (B_blk*max(N,M), C) f32 VMEM scratch for pre-Wo attention outputs
    """
    f32 = jnp.float32
    cdt = wq_ref.dtype                       # matmul operand dtype (f32 or bf16)
    b_blk, n, c = x_ref.shape
    m = ind_ref.shape[1]
    dh = c // heads
    eps = 1e-5

    def layer_norm(h, g, beta):
        mu = jnp.mean(h, axis=-1, keepdims=True)
        var = jnp.mean((h - mu) ** 2, axis=-1, keepdims=True)
        return (h - mu) * jax.lax.rsqrt(var + eps) * g + beta

    def softmax_rows(s):
        s = s - jnp.max(s, axis=-1, keepdims=True)
        p = jnp.exp(s)
        return p * pl.reciprocal(jnp.sum(p, axis=-1, keepdims=True),
                                 approx=approx_recip)

    def mab(q_proj_c, q_shared, y_f32, add_residual, lq, lk, mi):
        """One MAB.  q_proj_c: scaled, biased Q projection in compute dtype
        ((lq, C) if q_shared else (b_blk*lq, C)).  y_f32: (b_blk*lk, C) K/V source.
        Returns (b_blk*lq, C) f32."""
        rows_q = b_blk * lq
        vec = vec_ref[mi]                                        # (7, C) f32

        # Fused K/V projection: one full-width (rows_k, C) @ (C, 2C) matmul.
        kv = jnp.dot(y_f32.astype(cdt), wkv_ref[mi],
                     preferred_element_type=f32) + bkv_ref[mi]
        kv_c = kv.astype(cdt)                                    # cast once

        # Attention per batch element / head.  Results go straight into the VMEM
        # scratch at their (sublane, lane) offsets: no value concats, live ranges
        # bounded per iteration.  b_blk and heads are small, statically capped.
        for bi in range(b_blk):
            qo = 0 if q_shared else bi * lq
            for h in range(heads):
                qb = q_proj_c[qo:qo + lq, h * dh:(h + 1) * dh]
                kb = kv_c[bi * lk:(bi + 1) * lk, h * dh:(h + 1) * dh]
                vb = kv_c[bi * lk:(bi + 1) * lk, c + h * dh:c + (h + 1) * dh]
                s = jax.lax.dot_general(qb, kb, (((1,), (1,)), ((), ())),
                                        preferred_element_type=f32)  # scale pre-folded
                p = softmax_rows(s)
                attn_ref[bi * lq:(bi + 1) * lq, h * dh:(h + 1) * dh] = jnp.dot(
                    p.astype(cdt), vb, preferred_element_type=f32)

        attn = attn_ref[0:rows_q, :]
        # Single full-width output projection, then residual + LN + FFN + LN (f32).
        o = jnp.dot(attn.astype(cdt), wo_ref[mi],
                    preferred_element_type=f32) + vec[1:2]
        h1 = layer_norm(add_residual(o), vec[3:4], vec[4:5])
        lin = jnp.dot(h1.astype(cdt), wl_ref[mi],
                      preferred_element_type=f32) + vec[2:3]
        return layer_norm(h1 + jnp.maximum(lin, 0.0), vec[5:6], vec[6:7])

    x_f32 = x_ref[...].astype(f32).reshape(b_blk * n, c)
    ind_f32 = ind_ref[...].astype(f32).reshape(m, c)

    # ---- MAB1(I, x): queries = inducing points (shared across the batch block) ----
    q1 = (jnp.dot(ind_f32.astype(cdt), wq_ref[0], preferred_element_type=f32)
          + vec_ref[0, 0:1]).astype(cdt)                         # (M, C), done once

    def res1(o):                                                 # residual: + I per element
        if b_blk == 1:
            return o + ind_f32
        return (o.reshape(b_blk, m, c) + ind_f32).reshape(b_blk * m, c)

    h = mab(q1, True, x_f32, res1, m, n, 0)                      # (b_blk*M, C), stays in VMEM

    # ---- MAB2(x, h): queries = x, keys/values = h -------------------------------
    q2 = (jnp.dot(x_f32.astype(cdt), wq_ref[1], preferred_element_type=f32)
          + vec_ref[1, 0:1]).astype(cdt)                         # (b_blk*N, C)
    out = mab(q2, False, h, lambda o: o + x_f32, n, m, 1)

    o_ref[...] = out.reshape(b_blk, n, c).astype(o_ref.dtype)


# ---------------------------- host-side parameter packing -------------------- #

def pack_isab_params(params, heads, compute_dtype=jnp.float32):
    """Pack natural ISAB params into MXU-friendly slabs.  Call ONCE, outside the
    per-forward path (the reshapes/concats here are ordinary XLA ops)."""
    C = params["mab1"]["wq"].shape[0]
    assert C % heads == 0, "channels must be divisible by heads"
    scale = 1.0 / float(C // heads) ** 0.5

    def pack_mab(p):
        wq = (p["wq"] * scale).astype(compute_dtype)                        # scale folded
        wkv = jnp.concatenate([p["wk"], p["wv"]], axis=1).astype(compute_dtype)  # (C, 2C)
        bkv = jnp.concatenate([p["bk"], p["bv"]]).reshape(1, 2 * C).astype(jnp.float32)
        vec = jnp.stack([p["bq"] * scale, p["bo"], p["bl"],
                         p["ln1g"], p["ln1b"], p["ln2g"], p["ln2b"]]).astype(jnp.float32)
        return (wq, wkv, p["wo"].astype(compute_dtype),
                p["wl"].astype(compute_dtype), bkv, vec)

    m1 = pack_mab(params["mab1"])
    m2 = pack_mab(params["mab2"])
    st = lambda a, b: jnp.stack([a, b], axis=0)
    return dict(
        ind=params["ind"],                 # (1, M, C)
        wq=st(m1[0], m2[0]),               # (2, C, C)
        wkv=st(m1[1], m2[1]),              # (2, C, 2C)
        wo=st(m1[2], m2[2]),               # (2, C, C)
        wl=st(m1[3], m2[3]),               # (2, C, C)
        bkv=st(m1[4], m2[4]),              # (2, 1, 2C)
        vec=st(m1[5], m2[5]),              # (2, 7, C)
    )


# ------------------------------ host-side wrapper ---------------------------- #

def _choose_blocking(B, N):
    """>=4 grid steps when the batch allows (pipelining + both v7x TCs busy),
    ~256 rows per block otherwise, unroll capped at 8 elements per step."""
    b_blk = min(B, max(1, 256 // max(N, 1)), 8)
    if pl.cdiv(B, b_blk) < 4:
        b_blk = max(1, B // 4)
    grid_b = pl.cdiv(B, b_blk)
    return b_blk, grid_b


def isab_forward(x, packed, heads, *, approx_recip=False):
    """ISAB(x) = MAB2(x, MAB1(I, x)) as a single fused Pallas kernel.
    `packed` must come from pack_isab_params (pack once, reuse across calls)."""
    B, N, C = x.shape
    M = packed["ind"].shape[1]
    assert C % heads == 0

    b_blk, grid_b = _choose_blocking(B, N)
    B_pad = grid_b * b_blk
    if B_pad != B:                                   # pad batch instead of b_blk=1 fallback
        x = jnp.concatenate([x, jnp.zeros((B_pad - B, N, C), x.dtype)], axis=0)

    def resident(a):                                 # full-array block pinned across the grid
        nd = a.ndim
        return pl.BlockSpec(a.shape, lambda g, nd=nd: (0,) * nd)

    kern = functools.partial(_isab_kernel, heads=heads, approx_recip=approx_recip)
    out = pl.pallas_call(
        kern,
        out_shape=jax.ShapeDtypeStruct((B_pad, N, C), x.dtype),
        grid=(grid_b,),
        in_specs=[
            pl.BlockSpec((b_blk, N, C), lambda g: (g, 0, 0)),   # x
            resident(packed["ind"]),
            resident(packed["wq"]), resident(packed["wkv"]),
            resident(packed["wo"]), resident(packed["wl"]),
            resident(packed["bkv"]), resident(packed["vec"]),
        ],
        out_specs=pl.BlockSpec((b_blk, N, C), lambda g: (g, 0, 0)),
        scratch_shapes=[pltpu.VMEM((b_blk * max(N, M), C), jnp.float32)],
        compiler_params=pltpu.CompilerParams(
            dimension_semantics=("parallel",),
            vmem_limit_bytes=64 * 1024 * 1024),      # raise v5e's 16 MiB default; <= v7x's 64 MiB
    )(x, packed["ind"], packed["wq"], packed["wkv"], packed["wo"],
      packed["wl"], packed["bkv"], packed["vec"])
    return out[:B] if B_pad != B else out


# --------------------------- parameter construction -------------------------- #

def _xavier(key, shape):
    fan_in, fan_out = shape[-2], shape[-1]
    limit = (6.0 / (fan_in + fan_out)) ** 0.5
    return jax.random.uniform(key, shape, jnp.float32, -limit, limit)


def make_mab_params(key, C):
    ks = jax.random.split(key, 14)
    small = lambda k, shape: 0.02 * jax.random.normal(k, shape, jnp.float32)
    return dict(
        wq=_xavier(ks[0], (C, C)), wk=_xavier(ks[1], (C, C)), wv=_xavier(ks[2], (C, C)),
        bq=small(ks[3], (C,)), bk=small(ks[4], (C,)), bv=small(ks[5], (C,)),
        wo=_xavier(ks[6], (C, C)), bo=small(ks[7], (C,)),
        wl=_xavier(ks[8], (C, C)), bl=small(ks[9], (C,)),
        ln1g=1.0 + small(ks[10], (C,)), ln1b=small(ks[11], (C,)),
        ln2g=1.0 + small(ks[12], (C,)), ln2b=small(ks[13], (C,)),
    )


def make_isab_params(key, C, M):
    k_ind, k1, k2 = jax.random.split(key, 3)
    return dict(
        ind=_xavier(k_ind, (1, M, C)),
        mab1=make_mab_params(k1, C),
        mab2=make_mab_params(k2, C),
    )


# ------------------------------ pure-JAX reference --------------------------- #

def _ln(x, g, b):
    mu = jnp.mean(x, axis=-1, keepdims=True)
    var = jnp.mean((x - mu) ** 2, axis=-1, keepdims=True)
    return (x - mu) * jax.lax.rsqrt(var + 1e-5) * g + b


def mab_ref(x, y, p, heads):
    B, Lq, C = x.shape
    Lk = y.shape[1]
    D = C // heads
    q = x @ p["wq"] + p["bq"]
    k = y @ p["wk"] + p["bk"]
    v = y @ p["wv"] + p["bv"]
    qh = q.reshape(B, Lq, heads, D).transpose(0, 2, 1, 3)
    kh = k.reshape(B, Lk, heads, D).transpose(0, 2, 1, 3)
    vh = v.reshape(B, Lk, heads, D).transpose(0, 2, 1, 3)
    s = jnp.einsum("bhqd,bhkd->bhqk", qh, kh) / (D ** 0.5)
    a = jax.nn.softmax(s, axis=-1)
    o = jnp.einsum("bhqk,bhkd->bhqd", a, vh).transpose(0, 2, 1, 3).reshape(B, Lq, C)
    o = o @ p["wo"] + p["bo"]
    h1 = _ln(o + x, p["ln1g"], p["ln1b"])
    h2 = h1 + jax.nn.relu(h1 @ p["wl"] + p["bl"])
    return _ln(h2, p["ln2g"], p["ln2b"])


def isab_ref(x, params, heads):
    B = x.shape[0]
    ind = jnp.broadcast_to(params["ind"], (B,) + params["ind"].shape[1:])
    h = mab_ref(ind, x, params["mab1"], heads)
    return mab_ref(x, h, params["mab2"], heads)


# ------------------------------------- main ----------------------------------- #

if __name__ == "__main__":
    B, N, C, M, HEADS = 2, 16, 32, 8, 2   # batch, set size, channels, induced pts, heads

    key = jax.random.PRNGKey(0)
    k_x, k_p = jax.random.split(key)
    x = jax.random.normal(k_x, (B, N, C), jnp.float32)
    params = make_isab_params(k_p, C, M)
    ref = isab_ref(x, params, HEADS)

    # 1) f32 compute path — tight match against the pure-JAX reference.
    packed_f32 = pack_isab_params(params, HEADS, jnp.float32)     # packed ONCE
    fwd_f32 = jax.jit(functools.partial(isab_forward, heads=HEADS))
    out_f32 = jax.block_until_ready(fwd_f32(x, packed_f32))
    np.testing.assert_allclose(np.asarray(out_f32), np.asarray(ref),
                               rtol=2e-4, atol=2e-4)

    # 2) bf16 matmul path (valid on v5e/v6e/v7x MXUs) + approximate softmax recip.
    packed_bf16 = pack_isab_params(params, HEADS, jnp.bfloat16)
    fwd_bf16 = jax.jit(functools.partial(isab_forward, heads=HEADS, approx_recip=True))
    out_bf16 = jax.block_until_ready(fwd_bf16(x, packed_bf16))
    np.testing.assert_allclose(np.asarray(out_bf16), np.asarray(ref),
                               rtol=1e-1, atol=1e-1)

    # 3) Multi-element blocks + batch padding path (B=18 -> b_blk=4, grid=5, pad to 20).
    x18 = jax.random.normal(jax.random.PRNGKey(1), (18, N, C), jnp.float32)
    out18 = jax.block_until_ready(fwd_f32(x18, packed_f32))
    np.testing.assert_allclose(np.asarray(out18),
                               np.asarray(isab_ref(x18, params, HEADS)),
                               rtol=2e-4, atol=2e-4)

    print("KERNEL_OK")
</pallas_src>

<mosaic_0001>
module attributes {stable_mosaic.version = 11 : i64} {
  func.func @_isab_kernel(%arg0: i32, %arg1: memref<1x16x32xf32, #tpu.memory_space<vmem>>, %arg2: memref<1x8x32xf32, #tpu.memory_space<vmem>>, %arg3: memref<2x32x32xf32, #tpu.memory_space<vmem>>, %arg4: memref<2x32x64xf32, #tpu.memory_space<vmem>>, %arg5: memref<2x32x32xf32, #tpu.memory_space<vmem>>, %arg6: memref<2x32x32xf32, #tpu.memory_space<vmem>>, %arg7: memref<2x1x64xf32, #tpu.memory_space<vmem>>, %arg8: memref<2x7x32xf32, #tpu.memory_space<vmem>>, %arg9: memref<1x16x32xf32, #tpu.memory_space<vmem>>, %arg10: memref<16x32xf32, #tpu.memory_space<vmem>>) attributes {dimension_semantics = [#tpu.dimension_semantics<parallel>], iteration_bounds = array<i64: 2>, scalar_prefetch = 0 : i64, scratch_operands = 1 : i64, tpu.core_type = #tpu.core_type<tc>, window_params = [{transform_indices = @transform_0, window_bounds = array<i64: 1, 16, 32>}, {pipeline_mode = #tpu.pipeline_mode<synchronous>, transform_indices = @transform_1, window_bounds = array<i64: 1, 8, 32>}, {pipeline_mode = #tpu.pipeline_mode<synchronous>, transform_indices = @transform_2, window_bounds = array<i64: 2, 32, 32>}, {pipeline_mode = #tpu.pipeline_mode<synchronous>, transform_indices = @transform_3, window_bounds = array<i64: 2, 32, 64>}, {pipeline_mode = #tpu.pipeline_mode<synchronous>, transform_indices = @transform_4, window_bounds = array<i64: 2, 32, 32>}, {pipeline_mode = #tpu.pipeline_mode<synchronous>, transform_indices = @transform_5, window_bounds = array<i64: 2, 32, 32>}, {pipeline_mode = #tpu.pipeline_mode<synchronous>, transform_indices = @transform_6, window_bounds = array<i64: 2, 1, 64>}, {pipeline_mode = #tpu.pipeline_mode<synchronous>, transform_indices = @transform_7, window_bounds = array<i64: 2, 7, 32>}, {transform_indices = @transform_8, window_bounds = array<i64: 1, 16, 32>}]} {
    %c0 = arith.constant 0 : index
    %c0_0 = arith.constant 0 : index
    %c0_1 = arith.constant 0 : index
    %0 = vector.load %arg1[%c0, %c0_0, %c0_1] : memref<1x16x32xf32, #tpu.memory_space<vmem>>, vector<1x16x32xf32>
    %1 = vector.shape_cast %0 : vector<1x16x32xf32> to vector<16x32xf32>
    %c0_2 = arith.constant 0 : index
    %c0_3 = arith.constant 0 : index
    %c0_4 = arith.constant 0 : index
    %2 = vector.load %arg2[%c0_2, %c0_3, %c0_4] : memref<1x8x32xf32, #tpu.memory_space<vmem>>, vector<1x8x32xf32>
    %3 = vector.shape_cast %2 : vector<1x8x32xf32> to vector<8x32xf32>
    %c0_5 = arith.constant 0 : index
    %c0_6 = arith.constant 0 : index
    %c0_7 = arith.constant 0 : index
    %4 = vector.load %arg3[%c0_5, %c0_6, %c0_7] : memref<2x32x32xf32, #tpu.memory_space<vmem>>, vector<1x32x32xf32>
    %5 = vector.shape_cast %4 : vector<1x32x32xf32> to vector<32x32xf32>
    %cst = arith.constant dense<0.000000e+00> : vector<8x32xf32>
    %6 = tpu.matmul %3, %5, %cst {dimension_numbers = #tpu.dot_dimension_numbers<[1], [0], [0], [1], [0, 0, 1, 1], [], []>} : vector<8x32xf32>, vector<32x32xf32>, vector<8x32xf32> -> vector<8x32xf32>
    %c0_8 = arith.constant 0 : index
    %c0_9 = arith.constant 0 : index
    %c0_10 = arith.constant 0 : index
    %7 = vector.load %arg8[%c0_8, %c0_9, %c0_10] : memref<2x7x32xf32, #tpu.memory_space<vmem>>, vector<1x1x32xf32>
    %8 = vector.shape_cast %7 : vector<1x1x32xf32> to vector<1x32xf32>
    %9 = vector.broadcast %8 : vector<1x32xf32> to vector<8x32xf32>
    %10 = arith.addf %6, %9 : vector<8x32xf32>
    %c0_11 = arith.constant 0 : index
    %c0_12 = arith.constant 0 : index
    %c0_13 = arith.constant 0 : index
    %11 = vector.load %arg8[%c0_11, %c0_12, %c0_13] : memref<2x7x32xf32, #tpu.memory_space<vmem>>, vector<1x7x32xf32>
    %12 = vector.shape_cast %11 : vector<1x7x32xf32> to vector<7x32xf32>
    %c0_14 = arith.constant 0 : index
    %c0_15 = arith.constant 0 : index
    %c0_16 = arith.constant 0 : index
    %13 = vector.load %arg4[%c0_14, %c0_15, %c0_16] : memref<2x32x64xf32, #tpu.memory_space<vmem>>, vector<1x32x64xf32>
    %14 = vector.shape_cast %13 : vector<1x32x64xf32> to vector<32x64xf32>
    %cst_17 = arith.constant dense<0.000000e+00> : vector<16x64xf32>
    %15 = tpu.matmul %1, %14, %cst_17 {dimension_numbers = #tpu.dot_dimension_numbers<[1], [0], [0], [1], [0, 0, 1, 1], [], []>} : vector<16x32xf32>, vector<32x64xf32>, vector<16x64xf32> -> vector<16x64xf32>
    %c0_18 = arith.constant 0 : index
    %c0_19 = arith.constant 0 : index
    %c0_20 = arith.constant 0 : index
    %16 = vector.load %arg7[%c0_18, %c0_19, %c0_20] : memref<2x1x64xf32, #tpu.memory_space<vmem>>, vector<1x1x64xf32>
    %17 = vector.shape_cast %16 : vector<1x1x64xf32> to vector<1x64xf32>
    %18 = vector.broadcast %17 : vector<1x64xf32> to vector<16x64xf32>
    %19 = arith.addf %15, %18 : vector<16x64xf32>
    %20 = vector.extract_strided_slice %10 {offsets = [0, 0], sizes = [8, 16], strides = [1, 1]} : vector<8x32xf32> to vector<8x16xf32>
    %21 = vector.extract_strided_slice %19 {offsets = [0, 0], sizes = [16, 16], strides = [1, 1]} : vector<16x64xf32> to vector<16x16xf32>
    %22 = vector.extract_strided_slice %19 {offsets = [0, 32], sizes = [16, 16], strides = [1, 1]} : vector<16x64xf32> to vector<16x16xf32>
    %cst_21 = arith.constant dense<0.000000e+00> : vector<8x16xf32>
    %23 = tpu.matmul %20, %21, %cst_21 {dimension_numbers = #tpu.dot_dimension_numbers<[1], [1], [0], [0], [0, 0, 1, 0], [], []>} : vector<8x16xf32>, vector<16x16xf32>, vector<8x16xf32> -> vector<8x16xf32>
    %cst_22 = arith.constant dense<0xFF800000> : vector<8xf32>
    %24 = vector.multi_reduction <maximumf>, %23, %cst_22 [1] : vector<8x16xf32> to vector<8xf32>
    %25 = vector.shape_cast %24 : vector<8xf32> to vector<8x1xf32>
    %26 = vector.broadcast %25 : vector<8x1xf32> to vector<8x16xf32>
    %27 = arith.subf %23, %26 : vector<8x16xf32>
    %28 = math.exp %27 : vector<8x16xf32>
    %cst_23 = arith.constant dense<0.000000e+00> : vector<8xf32>
    %29 = vector.multi_reduction <add>, %28, %cst_23 [1] : vector<8x16xf32> to vector<8xf32>
    %30 = vector.shape_cast %29 : vector<8xf32> to vector<8x1xf32>
    %31 = tpu.reciprocal %30 : vector<8x1xf32> -> vector<8x1xf32>
    %32 = vector.broadcast %31 : vector<8x1xf32> to vector<8x16xf32>
    %33 = arith.mulf %28, %32 : vector<8x16xf32>
    %cst_24 = arith.constant dense<0.000000e+00> : vector<8x16xf32>
    %34 = tpu.matmul %33, %22, %cst_24 {dimension_numbers = #tpu.dot_dimension_numbers<[1], [0], [0], [1], [0, 0, 1, 1], [], []>} : vector<8x16xf32>, vector<16x16xf32>, vector<8x16xf32> -> vector<8x16xf32>
    %c0_25 = arith.constant 0 : index
    %c0_26 = arith.constant 0 : index
    %35 = vector.load %arg10[%c0_25, %c0_26] : memref<16x32xf32, #tpu.memory_space<vmem>>, vector<8x16xf32>
    tpu.vector_store %arg10[%c0_25, %c0_26], %34 {strides = array<i32>} : memref<16x32xf32, #tpu.memory_space<vmem>>, vector<8x16xf32>,
    %36 = vector.extract_strided_slice %10 {offsets = [0, 16], sizes = [8, 16], strides = [1, 1]} : vector<8x32xf32> to vector<8x16xf32>
    %37 = vector.extract_strided_slice %19 {offsets = [0, 16], sizes = [16, 16], strides = [1, 1]} : vector<16x64xf32> to vector<16x16xf32>
    %38 = vector.extract_strided_slice %19 {offsets = [0, 48], sizes = [16, 16], strides = [1, 1]} : vector<16x64xf32> to vector<16x16xf32>
    %cst_27 = arith.constant dense<0.000000e+00> : vector<8x16xf32>
    %39 = tpu.matmul %36, %37, %cst_27 {dimension_numbers = #tpu.dot_dimension_numbers<[1], [1], [0], [0], [0, 0, 1, 0], [], []>} : vector<8x16xf32>, vector<16x16xf32>, vector<8x16xf32> -> vector<8x16xf32>
    %cst_28 = arith.constant dense<0xFF800000> : vector<8xf32>
    %40 = vector.multi_reduction <maximumf>, %39, %cst_28 [1] : vector<8x16xf32> to vector<8xf32>
    %41 = vector.shape_cast %40 : vector<8xf32> to vector<8x1xf32>
    %42 = vector.broadcast %41 : vector<8x1xf32> to vector<8x16xf32>
    %43 = arith.subf %39, %42 : vector<8x16xf32>
    %44 = math.exp %43 : vector<8x16xf32>
    %cst_29 = arith.constant dense<0.000000e+00> : vector<8xf32>
    %45 = vector.multi_reduction <add>, %44, %cst_29 [1] : vector<8x16xf32> to vector<8xf32>
    %46 = vector.shape_cast %45 : vector<8xf32> to vector<8x1xf32>
    %47 = tpu.reciprocal %46 : vector<8x1xf32> -> vector<8x1xf32>
    %48 = vector.broadcast %47 : vector<8x1xf32> to vector<8x16xf32>
    %49 = arith.mulf %44, %48 : vector<8x16xf32>
    %cst_30 = arith.constant dense<0.000000e+00> : vector<8x16xf32>
    %50 = tpu.matmul %49, %38, %cst_30 {dimension_numbers = #tpu.dot_dimension_numbers<[1], [0], [0], [1], [0, 0, 1, 1], [], []>} : vector<8x16xf32>, vector<16x16xf32>, vector<8x16xf32> -> vector<8x16xf32>
    %c0_31 = arith.constant 0 : index
    %c16 = arith.constant 16 : index
    %51 = vector.load %arg10[%c0_31, %c16] : memref<16x32xf32, #tpu.memory_space<vmem>>, vector<8x16xf32>
    tpu.vector_store %arg10[%c0_31, %c16], %50 {strides = array<i32>} : memref<16x32xf32, #tpu.memory_space<vmem>>, vector<8x16xf32>,
    %c0_32 = arith.constant 0 : index
    %c0_33 = arith.constant 0 : index
    %52 = vector.load %arg10[%c0_32, %c0_33] : memref<16x32xf32, #tpu.memory_space<vmem>>, vector<8x32xf32>
    %c0_34 = arith.constant 0 : index
    %c0_35 = arith.constant 0 : index
    %c0_36 = arith.constant 0 : index
    %53 = vector.load %arg5[%c0_34, %c0_35, %c0_36] : memref<2x32x32xf32, #tpu.memory_space<vmem>>, vector<1x32x32xf32>
    %54 = vector.shape_cast %53 : vector<1x32x32xf32> to vector<32x32xf32>
    %cst_37 = arith.constant dense<0.000000e+00> : vector<8x32xf32>
    %55 = tpu.matmul %52, %54, %cst_37 {dimension_numbers = #tpu.dot_dimension_numbers<[1], [0], [0], [1], [0, 0, 1, 1], [], []>} : vector<8x32xf32>, vector<32x32xf32>, vector<8x32xf32> -> vector<8x32xf32>
    %56 = vector.extract_strided_slice %12 {offsets = [1, 0], sizes = [1, 32], strides = [1, 1]} : vector<7x32xf32> to vector<1x32xf32>
    %57 = vector.broadcast %56 : vector<1x32xf32> to vector<8x32xf32>
    %58 = arith.addf %55, %57 : vector<8x32xf32>
    %59 = arith.addf %58, %3 : vector<8x32xf32>
    %60 = vector.extract_strided_slice %12 {offsets = [3, 0], sizes = [1, 32], strides = [1, 1]} : vector<7x32xf32> to vector<1x32xf32>
    %61 = vector.extract_strided_slice %12 {offsets = [4, 0], sizes = [1, 32], strides = [1, 1]} : vector<7x32xf32> to vector<1x32xf32>
    %cst_38 = arith.constant dense<0.000000e+00> : vector<8xf32>
    %62 = vector.multi_reduction <add>, %59, %cst_38 [1] : vector<8x32xf32> to vector<8xf32>
    %63 = vector.shape_cast %62 : vector<8xf32> to vector<8x1xf32>
    %cst_39 = arith.constant 3.200000e+01 : f32
    %64 = vector.broadcast %cst_39 : f32 to vector<8x1xf32>
    %65 = arith.divf %63, %64 : vector<8x1xf32>
    %66 = vector.broadcast %65 : vector<8x1xf32> to vector<8x32xf32>
    %67 = arith.subf %59, %66 : vector<8x32xf32>
    %68 = arith.mulf %67, %67 : vector<8x32xf32>
    %cst_40 = arith.constant dense<0.000000e+00> : vector<8xf32>
    %69 = vector.multi_reduction <add>, %68, %cst_40 [1] : vector<8x32xf32> to vector<8xf32>
    %70 = vector.shape_cast %69 : vector<8xf32> to vector<8x1xf32>
    %cst_41 = arith.constant 3.200000e+01 : f32
    %71 = vector.broadcast %cst_41 : f32 to vector<8x1xf32>
    %72 = arith.divf %70, %71 : vector<8x1xf32>
    %73 = vector.broadcast %65 : vector<8x1xf32> to vector<8x32xf32>
    %74 = arith.subf %59, %73 : vector<8x32xf32>
    %cst_42 = arith.constant 9.99999974E-6 : f32
    %75 = vector.broadcast %cst_42 : f32 to vector<8x1xf32>
    %76 = arith.addf %72, %75 : vector<8x1xf32>
    %77 = math.rsqrt %76 : vector<8x1xf32>
    %78 = vector.broadcast %77 : vector<8x1xf32> to vector<8x32xf32>
    %79 = arith.mulf %74, %78 : vector<8x32xf32>
    %80 = vector.broadcast %60 : vector<1x32xf32> to vector<8x32xf32>
    %81 = arith.mulf %79, %80 : vector<8x32xf32>
    %82 = vector.broadcast %61 : vector<1x32xf32> to vector<8x32xf32>
    %83 = arith.addf %81, %82 : vector<8x32xf32>
    %c0_43 = arith.constant 0 : index
    %c0_44 = arith.constant 0 : index
    %c0_45 = arith.constant 0 : index
    %84 = vector.load %arg6[%c0_43, %c0_44, %c0_45] : memref<2x32x32xf32, #tpu.memory_space<vmem>>, vector<1x32x32xf32>
    %85 = vector.shape_cast %84 : vector<1x32x32xf32> to vector<32x32xf32>
    %cst_46 = arith.constant dense<0.000000e+00> : vector<8x32xf32>
    %86 = tpu.matmul %83, %85, %cst_46 {dimension_numbers = #tpu.dot_dimension_numbers<[1], [0], [0], [1], [0, 0, 1, 1], [], []>} : vector<8x32xf32>, vector<32x32xf32>, vector<8x32xf32> -> vector<8x32xf32>
    %87 = vector.extract_strided_slice %12 {offsets = [2, 0], sizes = [1, 32], strides = [1, 1]} : vector<7x32xf32> to vector<1x32xf32>
    %88 = vector.broadcast %87 : vector<1x32xf32> to vector<8x32xf32>
    %89 = arith.addf %86, %88 : vector<8x32xf32>
    %cst_47 = arith.constant 0.000000e+00 : f32
    %90 = vector.broadcast %cst_47 : f32 to vector<8x32xf32>
    %91 = arith.maximumf %89, %90 : vector<8x32xf32>
    %92 = arith.addf %83, %91 : vector<8x32xf32>
    %93 = vector.extract_strided_slice %12 {offsets = [5, 0], sizes = [1, 32], strides = [1, 1]} : vector<7x32xf32> to vector<1x32xf32>
    %94 = vector.extract_strided_slice %12 {offsets = [6, 0], sizes = [1, 32], strides = [1, 1]} : vector<7x32xf32> to vector<1x32xf32>
    %cst_48 = arith.constant dense<0.000000e+00> : vector<8xf32>
    %95 = vector.multi_reduction <add>, %92, %cst_48 [1] : vector<8x32xf32> to vector<8xf32>
    %96 = vector.shape_cast %95 : vector<8xf32> to vector<8x1xf32>
    %cst_49 = arith.constant 3.200000e+01 : f32
    %97 = vector.broadcast %cst_49 : f32 to vector<8x1xf32>
    %98 = arith.divf %96, %97 : vector<8x1xf32>
    %99 = vector.broadcast %98 : vector<8x1xf32> to vector<8x32xf32>
    %100 = arith.subf %92, %99 : vector<8x32xf32>
    %101 = arith.mulf %100, %100 : vector<8x32xf32>
    %cst_50 = arith.constant dense<0.000000e+00> : vector<8xf32>
    %102 = vector.multi_reduction <add>, %101, %cst_50 [1] : vector<8x32xf32> to vector<8xf32>
    %103 = vector.shape_cast %102 : vector<8xf32> to vector<8x1xf32>
    %cst_51 = arith.constant 3.200000e+01 : f32
    %104 = vector.broadcast %cst_51 : f32 to vector<8x1xf32>
    %105 = arith.divf %103, %104 : vector<8x1xf32>
    %106 = vector.broadcast %98 : vector<8x1xf32> to vector<8x32xf32>
    %107 = arith.subf %92, %106 : vector<8x32xf32>
    %cst_52 = arith.constant 9.99999974E-6 : f32
    %108 = vector.broadcast %cst_52 : f32 to vector<8x1xf32>
    %109 = arith.addf %105, %108 : vector<8x1xf32>
    %110 = math.rsqrt %109 : vector<8x1xf32>
    %111 = vector.broadcast %110 : vector<8x1xf32> to vector<8x32xf32>
    %112 = arith.mulf %107, %111 : vector<8x32xf32>
    %113 = vector.broadcast %93 : vector<1x32xf32> to vector<8x32xf32>
    %114 = arith.mulf %112, %113 : vector<8x32xf32>
    %115 = vector.broadcast %94 : vector<1x32xf32> to vector<8x32xf32>
    %116 = arith.addf %114, %115 : vector<8x32xf32>
    %c1 = arith.constant 1 : index
    %c0_53 = arith.constant 0 : index
    %c0_54 = arith.constant 0 : index
    %117 = vector.load %arg3[%c1, %c0_53, %c0_54] : memref<2x32x32xf32, #tpu.memory_space<vmem>>, vector<1x32x32xf32>
    %118 = vector.shape_cast %117 : vector<1x32x32xf32> to vector<32x32xf32>
    %cst_55 = arith.constant dense<0.000000e+00> : vector<16x32xf32>
    %119 = tpu.matmul %1, %118, %cst_55 {dimension_numbers = #tpu.dot_dimension_numbers<[1], [0], [0], [1], [0, 0, 1, 1], [], []>} : vector<16x32xf32>, vector<32x32xf32>, vector<16x32xf32> -> vector<16x32xf32>
    %c1_56 = arith.constant 1 : index
    %c0_57 = arith.constant 0 : index
    %c0_58 = arith.constant 0 : index
    %120 = vector.load %arg8[%c1_56, %c0_57, %c0_58] : memref<2x7x32xf32, #tpu.memory_space<vmem>>, vector<1x1x32xf32>
    %121 = vector.shape_cast %120 : vector<1x1x32xf32> to vector<1x32xf32>
    %122 = vector.broadcast %121 : vector<1x32xf32> to vector<16x32xf32>
    %123 = arith.addf %119, %122 : vector<16x32xf32>
    %c1_59 = arith.constant 1 : index
    %c0_60 = arith.constant 0 : index
    %c0_61 = arith.constant 0 : index
    %124 = vector.load %arg8[%c1_59, %c0_60, %c0_61] : memref<2x7x32xf32, #tpu.memory_space<vmem>>, vector<1x7x32xf32>
    %125 = vector.shape_cast %124 : vector<1x7x32xf32> to vector<7x32xf32>
    %c1_62 = arith.constant 1 : index
    %c0_63 = arith.constant 0 : index
    %c0_64 = arith.constant 0 : index
    %126 = vector.load %arg4[%c1_62, %c0_63, %c0_64] : memref<2x32x64xf32, #tpu.memory_space<vmem>>, vector<1x32x64xf32>
    %127 = vector.shape_cast %126 : vector<1x32x64xf32> to vector<32x64xf32>
    %cst_65 = arith.constant dense<0.000000e+00> : vector<8x64xf32>
    %128 = tpu.matmul %116, %127, %cst_65 {dimension_numbers = #tpu.dot_dimension_numbers<[1], [0], [0], [1], [0, 0, 1, 1], [], []>} : vector<8x32xf32>, vector<32x64xf32>, vector<8x64xf32> -> vector<8x64xf32>
    %c1_66 = arith.constant 1 : index
    %c0_67 = arith.constant 0 : index
    %c0_68 = arith.constant 0 : index
    %129 = vector.load %arg7[%c1_66, %c0_67, %c0_68] : memref<2x1x64xf32, #tpu.memory_space<vmem>>, vector<1x1x64xf32>
    %130 = vector.shape_cast %129 : vector<1x1x64xf32> to vector<1x64xf32>
    %131 = vector.broadcast %130 : vector<1x64xf32> to vector<8x64xf32>
    %132 = arith.addf %128, %131 : vector<8x64xf32>
    %133 = vector.extract_strided_slice %123 {offsets = [0, 0], sizes = [16, 16], strides = [1, 1]} : vector<16x32xf32> to vector<16x16xf32>
    %134 = vector.extract_strided_slice %132 {offsets = [0, 0], sizes = [8, 16], strides = [1, 1]} : vector<8x64xf32> to vector<8x16xf32>
    %135 = vector.extract_strided_slice %132 {offsets = [0, 32], sizes = [8, 16], strides = [1, 1]} : vector<8x64xf32> to vector<8x16xf32>
    %cst_69 = arith.constant dense<0.000000e+00> : vector<16x8xf32>
    %136 = tpu.matmul %133, %134, %cst_69 {dimension_numbers = #tpu.dot_dimension_numbers<[1], [1], [0], [0], [0, 0, 1, 0], [], []>} : vector<16x16xf32>, vector<8x16xf32>, vector<16x8xf32> -> vector<16x8xf32>
    %cst_70 = arith.constant dense<0xFF800000> : vector<16xf32>
    %137 = vector.multi_reduction <maximumf>, %136, %cst_70 [1] : vector<16x8xf32> to vector<16xf32>
    %138 = vector.shape_cast %137 : vector<16xf32> to vector<16x1xf32>
    %139 = vector.broadcast %138 : vector<16x1xf32> to vector<16x8xf32>
    %140 = arith.subf %136, %139 : vector<16x8xf32>
    %141 = math.exp %140 : vector<16x8xf32>
    %cst_71 = arith.constant dense<0.000000e+00> : vector<16xf32>
    %142 = vector.multi_reduction <add>, %141, %cst_71 [1] : vector<16x8xf32> to vector<16xf32>
    %143 = vector.shape_cast %142 : vector<16xf32> to vector<16x1xf32>
    %144 = tpu.reciprocal %143 : vector<16x1xf32> -> vector<16x1xf32>
    %145 = vector.broadcast %144 : vector<16x1xf32> to vector<16x8xf32>
    %146 = arith.mulf %141, %145 : vector<16x8xf32>
    %cst_72 = arith.constant dense<0.000000e+00> : vector<16x16xf32>
    %147 = tpu.matmul %146, %135, %cst_72 {dimension_numbers = #tpu.dot_dimension_numbers<[1], [0], [0], [1], [0, 0, 1, 1], [], []>} : vector<16x8xf32>, vector<8x16xf32>, vector<16x16xf32> -> vector<16x16xf32>
    %c0_73 = arith.constant 0 : index
    %c0_74 = arith.constant 0 : index
    %148 = vector.load %arg10[%c0_73, %c0_74] : memref<16x32xf32, #tpu.memory_space<vmem>>, vector<16x16xf32>
    tpu.vector_store %arg10[%c0_73, %c0_74], %147 {strides = array<i32>} : memref<16x32xf32, #tpu.memory_space<vmem>>, vector<16x16xf32>,
    %149 = vector.extract_strided_slice %123 {offsets = [0, 16], sizes = [16, 16], strides = [1, 1]} : vector<16x32xf32> to vector<16x16xf32>
    %150 = vector.extract_strided_slice %132 {offsets = [0, 16], sizes = [8, 16], strides = [1, 1]} : vector<8x64xf32> to vector<8x16xf32>
    %151 = vector.extract_strided_slice %132 {offsets = [0, 48], sizes = [8, 16], strides = [1, 1]} : vector<8x64xf32> to vector<8x16xf32>
    %cst_75 = arith.constant dense<0.000000e+00> : vector<16x8xf32>
    %152 = tpu.matmul %149, %150, %cst_75 {dimension_numbers = #tpu.dot_dimension_numbers<[1], [1], [0], [0], [0, 0, 1, 0], [], []>} : vector<16x16xf32>, vector<8x16xf32>, vector<16x8xf32> -> vector<16x8xf32>
    %cst_76 = arith.constant dense<0xFF800000> : vector<16xf32>
    %153 = vector.multi_reduction <maximumf>, %152, %cst_76 [1] : vector<16x8xf32> to vector<16xf32>
    %154 = vector.shape_cast %153 : vector<16xf32> to vector<16x1xf32>
    %155 = vector.broadcast %154 : vector<16x1xf32> to vector<16x8xf32>
    %156 = arith.subf %152, %155 : vector<16x8xf32>
    %157 = math.exp %156 : vector<16x8xf32>
    %cst_77 = arith.constant dense<0.000000e+00> : vector<16xf32>
    %158 = vector.multi_reduction <add>, %157, %cst_77 [1] : vector<16x8xf32> to vector<16xf32>
    %159 = vector.shape_cast %158 : vector<16xf32> to vector<16x1xf32>
    %160 = tpu.reciprocal %159 : vector<16x1xf32> -> vector<16x1xf32>
    %161 = vector.broadcast %160 : vector<16x1xf32> to vector<16x8xf32>
    %162 = arith.mulf %157, %161 : vector<16x8xf32>
    %cst_78 = arith.constant dense<0.000000e+00> : vector<16x16xf32>
    %163 = tpu.matmul %162, %151, %cst_78 {dimension_numbers = #tpu.dot_dimension_numbers<[1], [0], [0], [1], [0, 0, 1, 1], [], []>} : vector<16x8xf32>, vector<8x16xf32>, vector<16x16xf32> -> vector<16x16xf32>
    %c0_79 = arith.constant 0 : index
    %c16_80 = arith.constant 16 : index
    %164 = vector.load %arg10[%c0_79, %c16_80] : memref<16x32xf32, #tpu.memory_space<vmem>>, vector<16x16xf32>
    tpu.vector_store %arg10[%c0_79, %c16_80], %163 {strides = array<i32>} : memref<16x32xf32, #tpu.memory_space<vmem>>, vector<16x16xf32>,
    %c0_81 = arith.constant 0 : index
    %c0_82 = arith.constant 0 : index
    %165 = vector.load %arg10[%c0_81, %c0_82] : memref<16x32xf32, #tpu.memory_space<vmem>>, vector<16x32xf32>
    %c1_83 = arith.constant 1 : index
    %c0_84 = arith.constant 0 : index
    %c0_85 = arith.constant 0 : index
    %166 = vector.load %arg5[%c1_83, %c0_84, %c0_85] : memref<2x32x32xf32, #tpu.memory_space<vmem>>, vector<1x32x32xf32>
    %167 = vector.shape_cast %166 : vector<1x32x32xf32> to vector<32x32xf32>
    %cst_86 = arith.constant dense<0.000000e+00> : vector<16x32xf32>
    %168 = tpu.matmul %165, %167, %cst_86 {dimension_numbers = #tpu.dot_dimension_numbers<[1], [0], [0], [1], [0, 0, 1, 1], [], []>} : vector<16x32xf32>, vector<32x32xf32>, vector<16x32xf32> -> vector<16x32xf32>
    %169 = vector.extract_strided_slice %125 {offsets = [1, 0], sizes = [1, 32], strides = [1, 1]} : vector<7x32xf32> to vector<1x32xf32>
    %170 = vector.broadcast %169 : vector<1x32xf32> to vector<16x32xf32>
    %171 = arith.addf %168, %170 : vector<16x32xf32>
    %172 = arith.addf %171, %1 : vector<16x32xf32>
    %173 = vector.extract_strided_slice %125 {offsets = [3, 0], sizes = [1, 32], strides = [1, 1]} : vector<7x32xf32> to vector<1x32xf32>
    %174 = vector.extract_strided_slice %125 {offsets = [4, 0], sizes = [1, 32], strides = [1, 1]} : vector<7x32xf32> to vector<1x32xf32>
    %cst_87 = arith.constant dense<0.000000e+00> : vector<16xf32>
    %175 = vector.multi_reduction <add>, %172, %cst_87 [1] : vector<16x32xf32> to vector<16xf32>
    %176 = vector.shape_cast %175 : vector<16xf32> to vector<16x1xf32>
    %cst_88 = arith.constant 3.200000e+01 : f32
    %177 = vector.broadcast %cst_88 : f32 to vector<16x1xf32>
    %178 = arith.divf %176, %177 : vector<16x1xf32>
    %179 = vector.broadcast %178 : vector<16x1xf32> to vector<16x32xf32>
    %180 = arith.subf %172, %179 : vector<16x32xf32>
    %181 = arith.mulf %180, %180 : vector<16x32xf32>
    %cst_89 = arith.constant dense<0.000000e+00> : vector<16xf32>
    %182 = vector.multi_reduction <add>, %181, %cst_89 [1] : vector<16x32xf32> to vector<16xf32>
    %183 = vector.shape_cast %182 : vector<16xf32> to vector<16x1xf32>
    %cst_90 = arith.constant 3.200000e+01 : f32
    %184 = vector.broadcast %cst_90 : f32 to vector<16x1xf32>
    %185 = arith.divf %183, %184 : vector<16x1xf32>
    %186 = vector.broadcast %178 : vector<16x1xf32> to vector<16x32xf32>
    %187 = arith.subf %172, %186 : vector<16x32xf32>
    %cst_91 = arith.constant 9.99999974E-6 : f32
    %188 = vector.broadcast %cst_91 : f32 to vector<16x1xf32>
    %189 = arith.addf %185, %188 : vector<16x1xf32>
    %190 = math.rsqrt %189 : vector<16x1xf32>
    %191 = vector.broadcast %190 : vector<16x1xf32> to vector<16x32xf32>
    %192 = arith.mulf %187, %191 : vector<16x32xf32>
    %193 = vector.broadcast %173 : vector<1x32xf32> to vector<16x32xf32>
    %194 = arith.mulf %192, %193 : vector<16x32xf32>
    %195 = vector.broadcast %174 : vector<1x32xf32> to vector<16x32xf32>
    %196 = arith.addf %194, %195 : vector<16x32xf32>
    %c1_92 = arith.constant 1 : index
    %c0_93 = arith.constant 0 : index
    %c0_94 = arith.constant 0 : index
    %197 = vector.load %arg6[%c1_92, %c0_93, %c0_94] : memref<2x32x32xf32, #tpu.memory_space<vmem>>, vector<1x32x32xf32>
    %198 = vector.shape_cast %197 : vector<1x32x32xf32> to vector<32x32xf32>
    %cst_95 = arith.constant dense<0.000000e+00> : vector<16x32xf32>
    %199 = tpu.matmul %196, %198, %cst_95 {dimension_numbers = #tpu.dot_dimension_numbers<[1], [0], [0], [1], [0, 0, 1, 1], [], []>} : vector<16x32xf32>, vector<32x32xf32>, vector<16x32xf32> -> vector<16x32xf32>
    %200 = vector.extract_strided_slice %125 {offsets = [2, 0], sizes = [1, 32], strides = [1, 1]} : vector<7x32xf32> to vector<1x32xf32>
    %201 = vector.broadcast %200 : vector<1x32xf32> to vector<16x32xf32>
    %202 = arith.addf %199, %201 : vector<16x32xf32>
    %cst_96 = arith.constant 0.000000e+00 : f32
    %203 = vector.broadcast %cst_96 : f32 to vector<16x32xf32>
    %204 = arith.maximumf %202, %203 : vector<16x32xf32>
    %205 = arith.addf %196, %204 : vector<16x32xf32>
    %206 = vector.extract_strided_slice %125 {offsets = [5, 0], sizes = [1, 32], strides = [1, 1]} : vector<7x32xf32> to vector<1x32xf32>
    %207 = vector.extract_strided_slice %125 {offsets = [6, 0], sizes = [1, 32], strides = [1, 1]} : vector<7x32xf32> to vector<1x32xf32>
    %cst_97 = arith.constant dense<0.000000e+00> : vector<16xf32>
    %208 = vector.multi_reduction <add>, %205, %cst_97 [1] : vector<16x32xf32> to vector<16xf32>
    %209 = vector.shape_cast %208 : vector<16xf32> to vector<16x1xf32>
    %cst_98 = arith.constant 3.200000e+01 : f32
    %210 = vector.broadcast %cst_98 : f32 to vector<16x1xf32>
    %211 = arith.divf %209, %210 : vector<16x1xf32>
    %212 = vector.broadcast %211 : vector<16x1xf32> to vector<16x32xf32>
    %213 = arith.subf %205, %212 : vector<16x32xf32>
    %214 = arith.mulf %213, %213 : vector<16x32xf32>
    %cst_99 = arith.constant dense<0.000000e+00> : vector<16xf32>
    %215 = vector.multi_reduction <add>, %214, %cst_99 [1] : vector<16x32xf32> to vector<16xf32>
    %216 = vector.shape_cast %215 : vector<16xf32> to vector<16x1xf32>
    %cst_100 = arith.constant 3.200000e+01 : f32
    %217 = vector.broadcast %cst_100 : f32 to vector<16x1xf32>
    %218 = arith.divf %216, %217 : vector<16x1xf32>
    %219 = vector.broadcast %211 : vector<16x1xf32> to vector<16x32xf32>
    %220 = arith.subf %205, %219 : vector<16x32xf32>
    %cst_101 = arith.constant 9.99999974E-6 : f32
    %221 = vector.broadcast %cst_101 : f32 to vector<16x1xf32>
    %222 = arith.addf %218, %221 : vector<16x1xf32>
    %223 = math.rsqrt %222 : vector<16x1xf32>
    %224 = vector.broadcast %223 : vector<16x1xf32> to vector<16x32xf32>
    %225 = arith.mulf %220, %224 : vector<16x32xf32>
    %226 = vector.broadcast %206 : vector<1x32xf32> to vector<16x32xf32>
    %227 = arith.mulf %225, %226 : vector<16x32xf32>
    %228 = vector.broadcast %207 : vector<1x32xf32> to vector<16x32xf32>
    %229 = arith.addf %227, %228 : vector<16x32xf32>
    %230 = vector.shape_cast %229 : vector<16x32xf32> to vector<1x16x32xf32>
    %c0_102 = arith.constant 0 : index
    %c0_103 = arith.constant 0 : index
    %c0_104 = arith.constant 0 : index
    %231 = vector.load %arg9[%c0_102, %c0_103, %c0_104] : memref<1x16x32xf32, #tpu.memory_space<vmem>>, vector<1x16x32xf32>
    tpu.vector_store %arg9[%c0_102, %c0_103, %c0_104], %230 {strides = array<i32>} : memref<1x16x32xf32, #tpu.memory_space<vmem>>, vector<1x16x32xf32>,
    return
  }
  func.func @transform_0(%arg0: i32) -> (i32, i32, i32) {
    %c0_i32 = arith.constant 0 : i32
    %c0_i32_0 = arith.constant 0 : i32
    %c0_i32_1 = arith.constant 0 : i32
    return %arg0, %c0_i32, %c0_i32_0 : i32, i32, i32
  }
  func.func @transform_1(%arg0: i32) -> (i32, i32, i32) {
    %c0_i32 = arith.constant 0 : i32
    %c0_i32_0 = arith.constant 0 : i32
    %c0_i32_1 = arith.constant 0 : i32
    %c0_i32_2 = arith.constant 0 : i32
    return %c0_i32, %c0_i32_0, %c0_i32_1 : i32, i32, i32
  }
  func.func @transform_2(%arg0: i32) -> (i32, i32, i32) {
    %c0_i32 = arith.constant 0 : i32
    %c0_i32_0 = arith.constant 0 : i32
    %c0_i32_1 = arith.constant 0 : i32
    %c0_i32_2 = arith.constant 0 : i32
    return %c0_i32, %c0_i32_0, %c0_i32_1 : i32, i32, i32
  }
  func.func @transform_3(%arg0: i32) -> (i32, i32, i32) {
    %c0_i32 = arith.constant 0 : i32
    %c0_i32_0 = arith.constant 0 : i32
    %c0_i32_1 = arith.constant 0 : i32
    %c0_i32_2 = arith.constant 0 : i32
    return %c0_i32, %c0_i32_0, %c0_i32_1 : i32, i32, i32
  }
  func.func @transform_4(%arg0: i32) -> (i32, i32, i32) {
    %c0_i32 = arith.constant 0 : i32
    %c0_i32_0 = arith.constant 0 : i32
    %c0_i32_1 = arith.constant 0 : i32
    %c0_i32_2 = arith.constant 0 : i32
    return %c0_i32, %c0_i32_0, %c0_i32_1 : i32, i32, i32
  }
  func.func @transform_5(%arg0: i32) -> (i32, i32, i32) {
    %c0_i32 = arith.constant 0 : i32
    %c0_i32_0 = arith.constant 0 : i32
    %c0_i32_1 = arith.constant 0 : i32
    %c0_i32_2 = arith.constant 0 : i32
    return %c0_i32, %c0_i32_0, %c0_i32_1 : i32, i32, i32
  }
  func.func @transform_6(%arg0: i32) -> (i32, i32, i32) {
    %c0_i32 = arith.constant 0 : i32
    %c0_i32_0 = arith.constant 0 : i32
    %c0_i32_1 = arith.constant 0 : i32
    %c0_i32_2 = arith.constant 0 : i32
    return %c0_i32, %c0_i32_0, %c0_i32_1 : i32, i32, i32
  }
  func.func @transform_7(%arg0: i32) -> (i32, i32, i32) {
    %c0_i32 = arith.constant 0 : i32
    %c0_i32_0 = arith.constant 0 : i32
    %c0_i32_1 = arith.constant 0 : i32
    %c0_i32_2 = arith.constant 0 : i32
    return %c0_i32, %c0_i32_0, %c0_i32_1 : i32, i32, i32
  }
  func.func @transform_8(%arg0: i32) -> (i32, i32, i32) {
    %c0_i32 = arith.constant 0 : i32
    %c0_i32_0 = arith.constant 0 : i32
    %c0_i32_1 = arith.constant 0 : i32
    return %arg0, %c0_i32, %c0_i32_0 : i32, i32, i32
  }
}

</mosaic_0001>

<bundles_post_ra>
// kernel: isab_forward.1
= control target key start
LH: loop header
LB: loop body
LE: loop exit
PB: predicated region body
PF: predicated region fallthrough
CT: control target
= control target key end

     0   :  { %s2188_s0 = inlined_call_operand.hbm [shape: f32[2,16,32], index: 0, kind: input, shape index: {}]   ;;  %s2189_s1 = inlined_call_operand.vmem [shape: f32[1,8,32], index: 1, kind: input, shape index: {}]   ;;  %s2190_s2 = inlined_call_operand.hbm [shape: f32[2,32,32], index: 2, kind: input, shape index: {}]   ;;  %s2191_s3 = inlined_call_operand.hbm [shape: f32[2,32,64], index: 3, kind: input, shape index: {}]   ;;  %s2192_s4 = inlined_call_operand.hbm [shape: f32[2,32,32], index: 4, kind: input, shape index: {}]   ;;  %s2193_s5 = inlined_call_operand.hbm [shape: f32[2,32,32], index: 5, kind: input, shape index: {}]   ;;  %s2194_s6 = inlined_call_operand.vmem [shape: f32[2,1,64], index: 6, kind: input, shape index: {}]   ;;  %s2195_s7 = inlined_call_operand.vmem [shape: f32[2,7,32], index: 7, kind: input, shape index: {}]   ;;  %s2196_s8 = inlined_call_operand.hbm [shape: f32[2,16,32], index: 8, kind: output, shape index: {}]  }
   0x1   :  { %2199 = sst [smem:[#allocation17_spill]] %s2190_s2 }
   0x2   :  { %2200 = sst [smem:[#allocation18_spill]] %s2191_s3 }
   0x3   :  { %13 = vsyncpa [#allocation4], 0 }
   0x4   :  { %15 = vsyncpa [#allocation4 + $0x1], 0 }
   0x5   :  { %16 = vsyncpa [#allocation7], 0 }
   0x6   :  { %17 = vsyncpa [#allocation10], 0 }
   0x7   :  { %18 = vsyncpa [#allocation5], 0 }
   0x8   :  { %20 = vsyncpa [#allocation5 + $0x1], 0  ;;  %s1858_s27 = smov 0   ;;  %s1860_s28 = smov 0  }
   0x9   :  { %s1862_s29 = smov 0   ;;  %s1864_s30 = smov 0  }
   0xa LB: > { %s1879_s9 = sadd.s32 4294967295, %s1798_s30   ;;  %s1369_s10 = sadd.s32 4294967294, %s1798_s30   ;;  %s1798_s30 = sphi %s1864_s30, %s2215_s30   ;;  %s1794_s29 = sphi %s1862_s29, %s2214_s29   ;;  %s1790_s28 = sphi %s1860_s28, %s2213_s28   ;;  %s1786_s27 = sphi %s1858_s27, %s2212_s27  }
   0xb   : > { %p46_p0 = scmp.ne.s32.totalorder %s1790_s28, %s1786_s27  ;;  %p47_p1 = scmp.eq.s32.totalorder %s1879_s9, 0 }
   0xc   : > { %p217_p2 = scmp.eq.s32.totalorder %s1879_s9, 1  ;;  %p223_p3 = scmp.eq.s32.totalorder %s1369_s10, 1 }
   0xd   : > { %p1888_p4 = por %p47_p1, %p46_p0  ;;  %p1370_p5 = scmp.ge.s32.totalorder %s1798_s30, 1 }
   0xe   : > { %p1893_p6 = por %p223_p3, %p46_p0  ;;  %p230_p7 = scmp.lt.s32.totalorder %s1798_s30, 3 }
   0xf   : > { %s2203_s2 = sld [smem:[#allocation17_spill]]  ;;  %s1800_s17 = smov [#allocation6]  }
  0x10   : > { %p1901_p8 = pnand %p1370_p5, %p230_p7  ;;  %s246_s18 = sshll.u32 %s1800_s17, 4  ;;  %s247_s18 = int_to_ptr.vmem [resolvable:$true] %s246_s18 }
  0x11   : > { %s272_s22 = sshll.u32 %s2192_s4, 4  ;;  %s2197_s23 = smov 128   ;;  %s273_s22 = int_to_ptr.hbm [resolvable:$true] %s272_s22 }
  0x12   : > { %p1446_p9 = pneg %p1901_p8  ;;  %s2198_s24 = smov 8  }
  0x13   : > { %s1803_s25 = smov [#allocation9]   ;;  %s2206_s3 = sld [smem:[#allocation18_spill]] }
  0x14   : > { %p1909_p10 = pnand %p1446_p9, %p47_p1  ;;  %s274_s26 = sshll.u32 %s1803_s25, 4  ;;  %s275_s26 = int_to_ptr.vmem [resolvable:$true] %s274_s26 }
  0x15   : > { %s244_s15 = sshll.u32 %s2203_s2, 4  ;;  %s1804_s20 = smov [#allocation8]   ;;  %s245_s15 = int_to_ptr.hbm [resolvable:$true] %s244_s15 }
  0x16   : > { %1449 = dma.hbm_to_vmem [thread:$0]  (!%p1909_p10), %s245_s15, 1024, %s247_s18, [#allocation7], %s2197_s23, %s2197_s23, %s2198_s24  }
  0x17   : > { %1455 = dma.hbm_to_vmem [thread:$0]  (!%p1909_p10), %s273_s22, 1024, %s275_s26, [#allocation10], %s2197_s23, %s2197_s23, %s2198_s24  }
  0x18   : > { %s286_s18 = sshll.u32 %s2193_s5, 4  ;;  %s260_s21 = sshll.u32 %s1804_s20, 4  ;;  %s287_s18 = int_to_ptr.hbm [resolvable:$true] %s286_s18  ;;  %s261_s21 = int_to_ptr.vmem [resolvable:$true] %s260_s21 }
  0x19   : > { %s258_s14 = sshll.u32 %s2206_s3, 4  ;;  %s1805_s25 = smov [#allocation11]   ;;  %s259_s14 = int_to_ptr.hbm [resolvable:$true] %s258_s14 }
  0x1a   : > { %1452 = dma.hbm_to_vmem [thread:$0]  (!%p1909_p10), %s259_s14, 1024, %s261_s21, [#allocation7], %s2197_s23, %s2197_s23, %s2198_s24  }
  0x1b   : > { %s288_s22 = sshll.u32 %s1805_s25, 4  ;;  %s1944_s26 = sadd.s32 1, %s1798_s30   ;;  %s289_s22 = int_to_ptr.vmem [resolvable:$true] %s288_s22 }
  0x1c   : > { %1458 = dma.hbm_to_vmem [thread:$0]  (!%p1909_p10), %s287_s18, 1024, %s289_s22, [#allocation10], %s2197_s23, %s2197_s23, %s2198_s24  }
  0x1d   : > { %s33_s10 = sadd.s32 1, %s1794_s29  ;;  %s30_s13 = ssub.s32 %s1798_s30, %s1944_s26 }
  0x1e   : > { %p40_p12 = scmp.ne.s32.totalorder %s1794_s29, %s1790_s28  ;;  %p31_p13 = scmp.eq.s32.totalorder %s30_s13, 0 }
  0x1f   : > { %p41_p0 = scmp.eq.s32.totalorder %s1798_s30, 0  ;;  %p1471_p5 = scmp.lt.s32.totalorder %s1798_s30, 2 }
  0x20   : > { %p1954_p3 = por %p217_p2, %p40_p12  ;;  %s308_s19 = sand.u32 1, %s1794_s29  }
  0x21   : > { %s1960_s15 = scalar_select %p31_p13, %s1794_s29, %s33_s10  }
  0x22   : > { %p42_p7 = por %p41_p0, %p40_p12  ;;  %s1376_s17 = sshll.u32 %s308_s19, 4 }
  0x23   : > { %s1424_s18 = sshll.u32 %s1798_s30, 4  ;;  %s312_s22 = scalar_lea.vmem [#allocation3], %s1376_s17 }
  0x24   : > { %s317_s25 = scalar_lea.hbm %s2188_s0, %s1424_s18  ;;  %s320_s23 = sshll.u32 %s312_s22, 4  ;;  %s321_s23 = int_to_ptr.vmem [resolvable:$true] %s320_s23 }
  0x25   : > { %s318_s13 = sshll.u32 %s317_s25, 4  ;;  %p1967_p2 = pnand %p1471_p5, %p42_p7  ;;  %s319_s13 = int_to_ptr.hbm [resolvable:$true] %s318_s13 }
  0x26   : > { %s309_s10 = scalar_lea.sflag [#allocation4], %s308_s19  ;;  %s1694_s2 = sshra.s32 %s319_s13, 4  ;;  %s1695_s2 = int_to_ptr.hbm [resolvable:$true] %s1694_s2 }
  0x27   : > { %s1696_s3 = scalar_lea.hbm %s1695_s2, 16  ;;  %p1698_p10 = pneg %p1967_p2 }
  0x28   : > { %p1697_p9 = scmp.ne.s32.totalorder %s1695_s2, %s1696_s3  ;;  %s1701_s20 = scalar_lea.hbm %s2188_s0, 32 }
  0x29   : > { %p1702_p0 = scmp.lt.s32.totalorder %s1695_s2, %s2188_s0  ;;  %p1703_p5 = scmp.lt.s32.totalorder %s1701_s20, %s1696_s3 }
  0x2a   : > { %p1699_p12 = pnand %p1698_p10, %p1697_p9 }
  0x2b   : > { %p1704_p7 = por %p1703_p5, %p1702_p0 }
  0x2c   : > { %p1700_p13 = pneg %p1699_p12 }
  0x2e   : > { %p1705_p11 = pnand %p1704_p7, %p1700_p13 }
  0x30   : > { %1708 = shalt.err (!%p1705_p11)
}
  0x31   : > { %s2209_s19 = smov 8   ;;  %s2210_s22 = smov 128  }
  0x32   : > { %1462 = dma.hbm_to_vmem [thread:$0]  (!%p1967_p2), %s319_s13, 256, %s321_s23, %s309_s10, %s2210_s22, %s2210_s22, %s2209_s19  }
  0x33   : > { %332 = sbr.rel (%p1901_p8) target bundleno = 3470 (0xd8e), region = 52  ;;  %s1987_s18 = sand.u32 (!%p1901_p8), 1, %s1790_s28  }
  0x34   : > { %s1380_s2 = sshll.u32 (!%p1901_p8), %s1987_s18, 4  ;;  %s335_s3 = scalar_lea.sflag (!%p1901_p8), [#allocation4], %s1987_s18 }
  0x35   : > { %s338_s17 = scalar_lea.vmem (!%p1901_p8), [#allocation3], %s1380_s2 }
  0x38   : > { %1769 = dma.done.wait (%p1888_p4), %s335_s3, 256  }
  0x39   : > { %1771 = vsyncadd (%p1888_p4), %s335_s3, 4294967040 }
  0x3a   : > { %1773 = dma.done.wait (%p47_p1), [#allocation7], 2048  }
  0x3b   : > { %1775 = vsyncadd (%p47_p1), [#allocation7], 4294965248 }
  0x3c   : > { %1777 = dma.done.wait (%p47_p1), [#allocation10], 2048  }
  0x3d   : > { %1779 = vsyncadd (%p47_p1), [#allocation10], 4294965248  ;;  %v429_v0 = vld [vmem:[#allocation8 + $0x18] sm:$0xff]  ;;  %v428_v1 = vld [vmem:[#allocation8 + $0x10] sm:$0xff]  ;;  %vm401_vm0 = vcmask 261120   ;;  %s1806_s13 = smov 112  }
  0x3e   : > { %452 = vmatpush.msra.mxu1 %v429_v0  ;;  %v398_v2 = vld [vmem:[#allocation6 + $0x18] sm:$0xff]  ;;  %v427_v3 = vld [vmem:[#allocation8 + $0x8] sm:$0xff]  ;;  %v397_v4 = vld [vmem:[#allocation6 + $0x10] sm:$0xff]  ;;  %vm463_vm1 = vcmask 130048   ;;  %s1807_s21 = smov 80   ;;  %s1808_s25 = smov 96  }
  0x3f   : > { %417 = vmatpush.msra.mxu0 %v398_v2  ;;  %v396_v5 = vld [vmem:[#allocation6 + $0x8] sm:$0xff]  ;;  %v426_v6 = vld [vmem:[#allocation8] sm:$0xff]  ;;  %v2010_v9 = vld [vmem:[%s2189_s1] sm:$0xff]  ;;  %s1809_s19 = smov 16   ;;  %vm636_vm10 = vcmask 261248   ;;  %s391_s10 = scalar_lea.vmem [#allocation12], %s1380_s2 }
  0x40   : > { %453 = vmatpush.msra.mxu1 %v428_v1  ;;  %v2005_v7 = vld [vmem:[%s338_s17] sm:$0xff]  ;;  %v2016_v10 = vld [vmem:[%s338_s17 + $0x8] sm:$0xff]  ;;  %s1425_s20 = sshll.u32 %s1879_s9, 4  ;;  %s1243_s9 = scalar_lea.sflag [#allocation5], %s1987_s18 }
  0x41   : > { %418 = vmatpush.msra.mxu0 %v397_v4  ;;  %v395_v8 = vld [vmem:[#allocation6] sm:$0xff]  ;;  %v1533_v11 = vld [vmem:[%s2195_s7] ss:$0 sm:$0xff]  ;;  %s1254_s2 = scalar_lea.hbm %s2196_s8, %s1425_s20  ;;  %s1744_s23 = scalar_lea.hbm %s2196_s8, 32 }
  0x42   : > { %454 = vmatpush.msra.mxu1 %v427_v3  ;;  %v1532_v15 = vld [vmem:[%s2194_s6] ss:$0 sm:$0xff]  ;;  %s1257_s22 = sshll.u32 %s1254_s2, 4  ;;  %s1258_s22 = int_to_ptr.hbm [resolvable:$true] %s1257_s22 }
  0x43   : > { %419 = vmatpush.msra.mxu0 %v396_v5  ;;  %v642_v5 = vld [vmem:[#allocation9 + $0x18] sm:$0xff]  ;;  %s1738_s3 = sshra.s32 %s1258_s22, 4  ;;  %s1739_s3 = int_to_ptr.hbm [resolvable:$true] %s1738_s3 }
  0x44   : > { %455 = vmatpush.msra.mxu1 %v426_v6  ;;  %v641_v6 = vld [vmem:[#allocation9 + $0x10] sm:$0xff]  ;;  %s1740_s17 = scalar_lea.hbm %s1739_s3, 16  ;;  %p1745_p11 = scmp.lt.s32.totalorder %s1739_s3, %s2196_s8 }
  0x45   : > { %1387 = vmatmul.msk.f32.vlgmr.msra.gmra.mxu1 %vm401_vm0, %v2005_v7  ;;  %420 = vmatpush.msra.mxu0 %v395_v8  ;;  %v640_v8 = vld [vmem:[#allocation9 + $0x8] sm:$0xff]  ;;  %p1741_p1 = scmp.ne.s32.totalorder %s1739_s3, %s1740_s17  ;;  %p1746_p2 = scmp.lt.s32.totalorder %s1744_s23, %s1740_s17 }
  0x46   : > { %1386 = vmatmul.msk.f32.vlgmr.msra.gmra.mxu0 %vm401_vm0, %v2010_v9 }
  0x47   : > { %p1742_p4 = pnand %p1741_p1, %p1954_p3  ;;  %p1747_p9 = por %p1746_p2, %p1745_p11 }
  0x49   : > { %p1743_p8 = pneg %p1742_p4 }
  0x4b   : > { %p1748_p10 = pnand %p1747_p9, %p1743_p8 }
  0x4d   : > { %1388 = vmatmul.msk.f32.gmra.mxu1 %vm401_vm0, %v2016_v10 }
  0xc2   : > { %v457_v12 = vpop.f32.mrf.mxu1 }
  0xc3   : > { %v422_v13 = vpop.f32.mrf.mxu0  ;;  %v458_v18 = vadd.f32 %v1532_v15, %v457_v12 }
  0xc4   : > { %v423_v14 = vadd.f32 %v1533_v11, %v422_v13  ;;  %v639_v11 = vld [vmem:[#allocation9] sm:$0xff] }
  0xc6   : > { %547 = vrot.lane.b32.xlu1 %v423_v14, %s1806_s13 }
  0xca   : > { %v460_v16 = vpop.f32.mrf.mxu1 }
  0xcb   : > { %v461_v17 = vadd.f32 %v1532_v15, %v460_v16 }
  0xcd   : > { %551 = vrot.lane.b32.xlu0 %v461_v17, %s1806_s13  ;;  %1389 = vmatpush.xpose.msk.msra.mxu2 %vm463_vm1, %v461_v17  ;;  %v1522_v19 = vpack.i.bf16 %v458_v18, %v461_v17 }
  0xd1   : > { %1390 = vmatpush.xpose.msk.msra.mxu2 %vm463_vm1, %v458_v18 }
  0xd4   : > { %1391 = vmatmul.msk.f32.vlgmr.msra.gmra.mxu2 %vm463_vm1, %v423_v14  ;;  %v2050_v14 = vld [vmem:[%s2195_s7] sm:$0x7f] }
  0xd5   : > { %549 = vrot.lane.b32.xlu0 %v458_v18, %s1806_s13  ;;  %659 = vmatpush.msrb.mxu2 %v642_v5  ;;  %v643_v15 = vperm.slane %v2050_v14, 1 }
  0xd7   : > { %660 = vmatpush.msrb.mxu2 %v641_v6 }
  0xd9   : > { %661 = vmatpush.msrb.mxu2 %v640_v8 }
  0xdb   : > { %662 = vmatpush.msrb.mxu2 %v639_v11 }
  0xdd   : > { %1523 = vrot.lane.b32.xlu0 %v1522_v19, %s1807_s21 }
  0xe5   : > { %1528 = vrot.lane.b32.xlu0 %v1522_v19, %s1808_s25 }
 0x138   : > { %v548_v22 = vpop.permute.xlu1 %547 }
 0x13f   : > { %v552_v20 = vpop.permute.xlu0 %551 }
 0x140   : > { %1393 = vmatpush.xpose.msk.msra.mxu3 %vm463_vm1, %v552_v20  ;;  %v1810_v20 = vmov 32.0  }
 0x147   : > { %v550_v21 = vpop.permute.xlu0 %549 }
 0x148   : > { %1394 = vmatpush.xpose.msk.msra.mxu3 %vm463_vm1, %v550_v21 }
 0x14b   : > { %1395 = vmatmul.msk.f32.vlgmr.msra.gmra.mxu3 %vm463_vm1, %v548_v22 }
 0x14f   : > { %v1524_v23 = vpop.permute.xlu0 %1523 }
 0x150   : > { %v1525_v24 = vunpack.i.l.bf16 %v1524_v23  ;;  %v1526_v25 = vunpack.i.h.bf16 %v1524_v23 }
 0x152   : > { %626 = vmatpush.msrb.mxu0 %v1525_v24 }
 0x154   : > { %627 = vmatpush.msrb.mxu0 %v1526_v25 }
 0x157   : > { %v1529_v26 = vpop.permute.xlu0 %1528  ;;  %v490_v27 = vpop.f32.mrf.mxu2 }
 0x158   : > { %v493_v28 = vsel %vm463_vm1, %v490_v27, -inf  ;;  %v1530_v29 = vunpack.i.l.bf16 %v1529_v26  ;;  %v1531_v30 = vunpack.i.h.bf16 %v1529_v26 }
 0x159   : > { %494 = vmax.xlane.f32.xlu2 %v493_v28 }
 0x15a   : > { %540 = vmatpush.msrb.mxu1 %v1530_v29 }
 0x15c   : > { %541 = vmatpush.msrb.mxu1 %v1531_v30 }
 0x1cc   : > { %v495_v33 = vpop.xlane.xlu2 %494 }
 0x1cd   : > { %v496_v36 = vsub.f32 %v490_v27, %v495_v33  ;;  %v702_v33 = vld [vmem:[#allocation11 + $0x8] sm:$0xff] }
 0x1ce   : > { %v576_v31 = vpop.f32.mrf.mxu3 }
 0x1cf   : > { %v579_v32 = vsel %vm463_vm1, %v576_v31, -inf  ;;  %v497_v38 = vmul.f32 1.442695, %v496_v36 }
 0x1d0   : > { %580 = vmax.xlane.f32.xlu1 %v579_v32  ;;  %v703_v32 = vld [vmem:[#allocation11 + $0x10] sm:$0xff] }
 0x243   : > { %v581_v34 = vpop.xlane.xlu1 %580 }
 0x244   : > { %v582_v35 = vsub.f32 %v576_v31, %v581_v34  ;;  %v704_v31 = vld [vmem:[#allocation11 + $0x18] sm:$0xff]  ;;  %v701_v34 = vld [vmem:[#allocation11] sm:$0xff] }
 0x245   : > { %721 = vmatpush.msrb.mxu3 %v704_v31 }
 0x246   : > { %v583_v37 = vmul.f32 1.442695, %v582_v35 }
 0x247   : > { %722 = vmatpush.msrb.mxu3 %v703_v32 }
 0x248   : > { %1536 = vpow2.f32 %v583_v37 }
 0x249   : > { %1538 = vpow2.f32 %v497_v38  ;;  %723 = vmatpush.msrb.mxu3 %v702_v33 }
 0x24b   : > { %724 = vmatpush.msrb.mxu3 %v701_v34 }
 0x24e   : > { %v1537_v39 = vpop.eup %1536 }
 0x24f   : > { %v585_v40 = vsel %vm463_vm1, %v1537_v39, 0.0  ;;  %v1539_v41 = vpop.eup %1538 }
 0x250   : > { %586 = vadd.xlane.f32.xlu2 %v585_v40  ;;  %v499_v42 = vsel %vm463_vm1, %v1539_v41, 0.0 }
 0x258   : > { %500 = vadd.xlane.f32.xlu2 %v499_v42 }
 0x2c3   : > { %v587_v43 = vpop.xlane.xlu2 %586 }
 0x2c4   : > { %1540 = vrcp.f32 %v587_v43  ;;  %v599_v48 = vand.u32 2147483648, %v587_v43  ;;  %v597_v50 = vand.u32 2147483647, %v587_v43  ;;  %vm593_vm3 = vweird.f32 %v587_v43 }
 0x2c6   : > { %v600_v53 = vor.u32 1.1754944e-38, %v599_v48  ;;  %vm598_vm5 = vcmp.eq.f32.partialorder %v597_v50, 8.507059e+37  ;;  %v705_v50 = vperm.slane %v2050_v14, 2 }
 0x2ca   : > { %v1541_v44 = vpop.eup %1540 }
 0x2cb   : > { %v589_v45 = vmul.f32 %v1541_v44, %v587_v43  ;;  %v501_v46 = vpop.xlane.xlu2 %500  ;;  %vm594_vm2 = vweird.f32 %v1541_v44 }
 0x2cc   : > { %1542 = vrcp.f32 %v501_v46  ;;  %vm595_vm4 = vmor %vm593_vm3, %vm594_vm2  ;;  %v513_v59 = vand.u32 2147483648, %v501_v46  ;;  %v511_v61 = vand.u32 2147483647, %v501_v46  ;;  %vm507_vm7 = vweird.f32 %v501_v46 }
 0x2cd   : > { %v590_v47 = vsub.f32 1.0, %v589_v45  ;;  %1544 = vrcp.f32 %v1810_v20 }
 0x2ce   : > { %v514_v63 = vor.u32 1.1754944e-38, %v513_v59  ;;  %vm512_vm9 = vcmp.eq.f32.partialorder %v511_v61, 8.507059e+37  ;;  %v793_v61 = vld [vmem:[#allocation8 + $0x38] sm:$0xff] }
 0x2cf   : > { %v591_v49 = vmul.f32 %v1541_v44, %v590_v47  ;;  %v699_v47 = vperm.slane %v2050_v14, 4  ;;  %814 = vmatpush.msra.mxu1 %v793_v61 }
 0x2d1   : > { %v592_v51 = vadd.f32 %v1541_v44, %v591_v49 }
 0x2d2   : > { %v1543_v52 = vpop.eup %1542 }
 0x2d3   : > { %v503_v54 = vmul.f32 %v1543_v52, %v501_v46  ;;  %v596_v55 = vsel %vm595_vm4, %v1541_v44, %v592_v51  ;;  %vm508_vm6 = vweird.f32 %v1543_v52  ;;  %v1545_v21 = vpop.eup %1544  ;;  %v697_v44 = vperm.slane %v2050_v14, 3 }
 0x2d4   : > { %v601_v56 = vsel %vm598_vm5, %v600_v53, %v596_v55  ;;  %vm509_vm8 = vmor %vm507_vm7, %vm508_vm6  ;;  %v672_v22 = vmul.f32 32.0, %v1545_v21  ;;  %vm676_vm11 = vweird.f32 %v1545_v21  ;;  %vm854_vm4 = vcmask 64512  }
 0x2d5   : > { %v504_v57 = vsub.f32 1.0, %v503_v54  ;;  %v602_v58 = vmul.f32 %v1537_v39, %v601_v56 }
 0x2d6   : > { %v673_v23 = vsub.f32 1.0, %v672_v22 }
 0x2d7   : > { %v505_v60 = vmul.f32 %v1543_v52, %v504_v57  ;;  %1396 = vmatmul.msk.f32.vlgmr.msrb.gmra.mxu0 %vm463_vm1, %v602_v58 }
 0x2d8   : > { %v674_v24 = vmul.f32 %v1545_v21, %v673_v23 }
 0x2d9   : > { %v506_v62 = vadd.f32 %v1543_v52, %v505_v60 }
 0x2da   : > { %v675_v25 = vadd.f32 %v1545_v21, %v674_v24  ;;  %v1535_v24 = vld [vmem:[%s2195_s7 + $0x8] ss:$0 sm:$0xff] }
 0x2db   : > { %v510_v0 = vsel %vm509_vm8, %v1543_v52, %v506_v62  ;;  %v792_v62 = vld [vmem:[#allocation8 + $0x30] sm:$0xff] }
 0x2dc   : > { %v515_v1 = vsel %vm512_vm9, %v514_v63, %v510_v0  ;;  %v2055_v26 = vsel %vm676_vm11, %v1545_v21, %v675_v25  ;;  %815 = vmatpush.msra.mxu1 %v792_v62  ;;  %v761_v63 = vld [vmem:[#allocation6 + $0x38] sm:$0xff]  ;;  %v791_v0 = vld [vmem:[#allocation8 + $0x28] sm:$0xff]  ;;  %v755_v21 = vperm.slane %v2050_v14, 6 }
 0x2dd   : > { %v516_v2 = vmul.f32 %v1539_v41, %v515_v1  ;;  %777 = vmatpush.msra.mxu0 %v761_v63  ;;  %v760_v1 = vld [vmem:[#allocation6 + $0x30] sm:$0xff] }
 0x2de   : > { %816 = vmatpush.msra.mxu1 %v791_v0 }
 0x2df   : > { %1392 = vmatmul.msk.f32.vlgmr.msrb.gmra.mxu1 %vm463_vm1, %v516_v2  ;;  %v790_v2 = vld [vmem:[#allocation8 + $0x20] sm:$0xff]  ;;  %778 = vmatpush.msra.mxu0 %v760_v1 }
 0x2e0   : > { %817 = vmatpush.msra.mxu1 %v790_v2 }
 0x354   : > { %v629_v3 = vpop.f32.mrf.mxu0 }
 0x355   : > { %633 = vrot.lane.b32.xlu2 %v629_v3, %s1809_s19  ;;  %v759_v3 = vld [vmem:[#allocation6 + $0x28] sm:$0xff] }
 0x356   : > { %779 = vmatpush.msra.mxu0 %v759_v3 }
 0x35c   : > { %v543_v4 = vpop.f32.mrf.mxu1 }
 0x35d   : > { %546 = vst.msk [vmem:[#allocation2] sm:$0xff] %vm463_vm1, %v543_v4  ;;  %v758_v4 = vld [vmem:[#allocation6 + $0x20] sm:$0xff] }
 0x35e   : > { %780 = vmatpush.msra.mxu0 %v758_v4 }
 0x35f   : > { %1400 = vmatmul.msk.f32.vlgmr.msra.gmra.mxu0 %vm401_vm0, %v2005_v7 }
 0x367   : > { %1401 = vmatmul.msk.f32.gmra.mxu0 %vm401_vm0, %v2016_v10 }
 0x3af   : > { %v634_v12 = vpop.permute.xlu2 %633 }
 0x3b0   : > { %637 = vst.msk [vmem:[#allocation2] sm:$0xff] %vm636_vm10, %v634_v12 }
 0x3b7   : > { %v638_v13 = vld [vmem:[#allocation2] sm:$0xff] }
 0x3b8   : > { %1397 = vmatmul.msk.f32.vlgmr.msrb.gmra.mxu2 %vm401_vm0, %v638_v13 }
 0x3dc   : > { %v782_v25 = vpop.f32.mrf.mxu0 }
 0x43b   : > { %v664_v16 = vpop.f32.mrf.mxu2 }
 0x43c   : > { %v665_v17 = vadd.f32 %v664_v16, %v643_v15 }
 0x43e   : > { %v667_v18 = vadd.f32 %v665_v17, %v2010_v9 }
 0x440   : > { %v668_v19 = vsel %vm401_vm0, %v667_v18, 0.0 }
 0x441   : > { %669 = vadd.xlane.f32.xlu0 %v668_v19 }
 0x4b4   : > { %v670_v27 = vpop.xlane.xlu0 %669 }
 0x4b5   : > { %v678_v28 = vmul.f32 %v2055_v26, %v670_v27  ;;  %v783_v27 = vadd.f32 %v1535_v24, %v782_v25 }
 0x4b7   : > { %v679_v29 = vsub.f32 %v667_v18, %v678_v28  ;;  %v753_v18 = vperm.slane %v2050_v14, 5  ;;  %937 = vrot.lane.b32.xlu0 %v783_v27, %s1806_s13  ;;  %v785_v28 = vpop.f32.mrf.mxu0  ;;  %v1534_v14 = vld [vmem:[%s2194_s6 + $0x1] ss:$0 sm:$0xff] }
 0x4b9   : > { %v680_v30 = vmul.f32 %v679_v29, %v679_v29 }
 0x4bb   : > { %v681_v9 = vsel %vm401_vm0, %v680_v30, 0.0 }
 0x4bc   : > { %682 = vadd.xlane.f32.xlu2 %v681_v9 }
 0x529   : > { %v938_v32 = vpop.permute.xlu0 %937 }
 0x52f   : > { %v683_v35 = vpop.xlane.xlu2 %682 }
 0x530   : > { %v684_v36 = vmul.f32 %v683_v35, %v2055_v26 }
 0x532   : > { %v685_v37 = vadd.f32 1e-05, %v684_v36 }
 0x534   : > { %1546 = vrsqrt.f32 %v685_v37  ;;  %vm692_vm13 = vweird.f32 %v685_v37 }
 0x53a   : > { %v1547_v38 = vpop.eup %1546 }
 0x53b   : > { %v687_v39 = vmul.f32 %v1547_v38, %v685_v37  ;;  %vm693_vm12 = vweird.f32 %v1547_v38 }
 0x53c   : > { %vm694_vm14 = vmor %vm692_vm13, %vm693_vm12 }
 0x53d   : > { %v688_v40 = vmul.f32 %v1547_v38, %v687_v39 }
 0x53f   : > { %v689_v41 = vmul.f32 0.5, %v688_v40 }
 0x541   : > { %v690_v42 = vsub.f32 1.5, %v689_v41 }
 0x543   : > { %v691_v43 = vmul.f32 %v1547_v38, %v690_v42 }
 0x545   : > { %v695_v45 = vsel %vm694_vm14, %v1547_v38, %v691_v43 }
 0x546   : > { %v696_v46 = vmul.f32 %v695_v45, %v679_v29  ;;  %v786_v29 = vadd.f32 %v1535_v24, %v785_v28 }
 0x548   : > { %v698_v48 = vmul.f32 %v697_v44, %v696_v46  ;;  %939 = vrot.lane.b32.xlu2 %v786_v29, %s1806_s13 }
 0x54a   : > { %v700_v49 = vadd.f32 %v699_v47, %v698_v48 }
 0x54c   : > { %1398 = vmatmul.msk.f32.vlgmr.msrb.gmra.mxu3 %vm401_vm0, %v700_v49 }
 0x5a2   : > { %v940_v33 = vpop.permute.xlu2 %939 }
 0x5cf   : > { %v726_v51 = vpop.f32.mrf.mxu3 }
 0x5d0   : > { %v727_v52 = vadd.f32 %v726_v51, %v705_v50 }
 0x5d2   : > { %v729_v53 = vmax.f32 %v727_v52, 0.0 }
 0x5d4   : > { %v730_v54 = vadd.f32 %v729_v53, %v700_v49 }
 0x5d6   : > { %v731_v55 = vsel %vm401_vm0, %v730_v54, 0.0 }
 0x5d7   : > { %732 = vadd.xlane.f32.xlu1 %v731_v55 }
 0x64a   : > { %v733_v56 = vpop.xlane.xlu1 %732 }
 0x64b   : > { %v734_v57 = vmul.f32 %v733_v56, %v2055_v26 }
 0x64d   : > { %v735_v58 = vsub.f32 %v730_v54, %v734_v57 }
 0x64f   : > { %v736_v59 = vmul.f32 %v735_v58, %v735_v58 }
 0x651   : > { %v737_v60 = vsel %vm401_vm0, %v736_v59, 0.0 }
 0x652   : > { %738 = vadd.xlane.f32.xlu1 %v737_v60 }
 0x6c5   : > { %v739_v5 = vpop.xlane.xlu1 %738 }
 0x6c6   : > { %v740_v6 = vmul.f32 %v739_v5, %v2055_v26 }
 0x6c8   : > { %v741_v8 = vadd.f32 1e-05, %v740_v6 }
 0x6ca   : > { %1548 = vrsqrt.f32 %v741_v8  ;;  %vm748_vm2 = vweird.f32 %v741_v8 }
 0x6d0   : > { %v1549_v11 = vpop.eup %1548 }
 0x6d1   : > { %v743_v12 = vmul.f32 %v1549_v11, %v741_v8  ;;  %vm749_vm15 = vweird.f32 %v1549_v11 }
 0x6d2   : > { %vm750_vm3 = vmor %vm748_vm2, %vm749_vm15 }
 0x6d3   : > { %v744_v13 = vmul.f32 %v1549_v11, %v743_v12 }
 0x6d5   : > { %v745_v15 = vmul.f32 0.5, %v744_v13 }
 0x6d7   : > { %v746_v16 = vsub.f32 1.5, %v745_v15 }
 0x6d9   : > { %v747_v17 = vmul.f32 %v1549_v11, %v746_v16 }
 0x6db   : > { %v751_v19 = vsel %vm750_vm3, %v1549_v11, %v747_v17 }
 0x6dc   : > { %v752_v20 = vmul.f32 %v751_v19, %v735_v58 }
 0x6de   : > { %v754_v22 = vmul.f32 %v753_v18, %v752_v20 }
 0x6e0   : > { %v756_v23 = vadd.f32 %v755_v21, %v754_v22 }
 0x6e2   : > { %1404 = vmatmul.msk.f32.vlgmr.msra.gmra.mxu1 %vm401_vm0, %v756_v23 }
 0x75f   : > { %v819_v30 = vpop.f32.mrf.mxu1 }
 0x760   : > { %v820_v9 = vadd.f32 %v1534_v14, %v819_v30 }
 0x762   : > { %941 = vrot.lane.b32.xlu1 %v820_v9, %s1806_s13  ;;  %1405 = vmatpush.xpose.msk.msra.mxu2 %vm463_vm1, %v820_v9 }
 0x765   : > { %1406 = vmatmul.msk.f32.vlgmr.msra.gmra.mxu2 %vm463_vm1, %v783_v27 }
 0x76d   : > { %1407 = vmatmul.msk.f32.gmra.mxu2 %vm463_vm1, %v786_v29 }
 0x7d4   : > { %v942_v31 = vpop.permute.xlu1 %941 }
 0x7d5   : > { %1410 = vmatpush.xpose.msk.msrb.mxu1 %vm463_vm1, %v942_v31 }
 0x7d8   : > { %1411 = vmatmul.msk.f32.vlgmr.msrb.gmra.mxu1 %vm463_vm1, %v938_v32 }
 0x7e0   : > { %1412 = vmatmul.msk.f32.gmra.mxu1 %vm463_vm1, %v940_v33 }
 0x7e8   : > { %v848_v34 = vpop.f32.mrf.mxu2 }
 0x7e9   : > { %v855_v35 = vsel %vm854_vm4, %v848_v34, -inf }
 0x7ea   : > { %856 = vmax.xlane.f32.xlu2 %v855_v35 }
 0x7f0   : > { %v851_v38 = vpop.f32.mrf.mxu2 }
 0x7f1   : > { %v858_v40 = vsel %vm854_vm4, %v851_v38, -inf }
 0x855   : > { %v966_v36 = vpop.f32.mrf.mxu1 }
 0x856   : > { %v972_v37 = vsel %vm854_vm4, %v966_v36, -inf }
 0x857   : > { %973 = vmax.xlane.f32.xlu1 %v972_v37 }
 0x85d   : > { %v969_v39 = vpop.f32.mrf.mxu1  ;;  %v857_v47 = vpop.xlane.xlu2 %856 }
 0x85e   : > { %v975_v41 = vsel %vm854_vm4, %v969_v39, -inf  ;;  %v861_v53 = vsub.f32 %v848_v34, %v857_v47 }
 0x85f   : > { %859 = vmax.xlane.f32.xlu1 %v858_v40  ;;  %976 = vmax.xlane.f32.xlu0 %v975_v41 }
 0x860   : > { %v863_v55 = vmul.f32 1.442695, %v861_v53 }
 0x8ca   : > { %v974_v42 = vpop.xlane.xlu1 %973 }
 0x8cb   : > { %v978_v43 = vsub.f32 %v966_v36, %v974_v42 }
 0x8cd   : > { %v980_v44 = vmul.f32 1.442695, %v978_v43 }
 0x8cf   : > { %1550 = vpow2.f32 %v980_v44 }
 0x8d2   : > { %v860_v45 = vpop.xlane.xlu1 %859  ;;  %v977_v46 = vpop.xlane.xlu0 %976 }
 0x8d3   : > { %v862_v48 = vsub.f32 %v851_v38, %v860_v45  ;;  %v979_v49 = vsub.f32 %v969_v39, %v977_v46 }
 0x8d5   : > { %v1551_v50 = vpop.eup %1550  ;;  %v865_v51 = vmul.f32 1.442695, %v862_v48  ;;  %v982_v52 = vmul.f32 1.442695, %v979_v49 }
 0x8d6   : > { %v984_v54 = vsel %vm854_vm4, %v1551_v50, 0.0 }
 0x8d7   : > { %1552 = vpow2.f32 %v865_v51  ;;  %985 = vadd.xlane.f32.xlu0 %v984_v54 }
 0x8d8   : > { %1554 = vpow2.f32 %v982_v52 }
 0x8d9   : > { %1556 = vpow2.f32 %v863_v55  ;;  %v1068_v55 = vld [vmem:[#allocation9 + $0x38] sm:$0xff] }
 0x8da   : > { %1088 = vmatpush.msrb.mxu2 %v1068_v55 }
 0x8dd   : > { %v2095_v56 = vpop.eup %1552 }
 0x8de   : > { %v1555_v57 = vpop.eup %1554  ;;  %v870_v58 = vsel %vm854_vm4, %v2095_v56, 0.0 }
 0x8df   : > { %871 = vadd.xlane.f32.xlu2 %v870_v58  ;;  %v987_v59 = vsel %vm854_vm4, %v1555_v57, 0.0  ;;  %v2100_v60 = vpop.eup %1556  ;;  %v1066_v58 = vld [vmem:[#allocation9 + $0x28] sm:$0xff] }
 0x8e0   : > { %988 = vadd.xlane.f32.xlu1 %v987_v59  ;;  %v867_v61 = vsel %vm854_vm4, %v2100_v60, 0.0 }
 0x8e8   : > { %868 = vadd.xlane.f32.xlu1 %v867_v61 }
 0x8eb   : > { %1020 = vrot.lane.b32.xlu0 %v820_v9, %s1807_s21 }
 0x901   : > { %903 = vrot.lane.b32.xlu1 %v820_v9, %s1808_s25 }
 0x94a   : > { %v986_v62 = vpop.xlane.xlu0 %985 }
 0x94b   : > { %1558 = vrcp.f32 %v986_v62  ;;  %v1001_v3 = vand.u32 2147483648, %v986_v62  ;;  %v999_v5 = vand.u32 2147483647, %v986_v62  ;;  %vm995_vm6 = vweird.f32 %v986_v62 }
 0x94d   : > { %v1002_v11 = vor.u32 1.1754944e-38, %v1001_v3  ;;  %vm1000_vm8 = vcmp.eq.f32.partialorder %v999_v5, 8.507059e+37 }
 0x951   : > { %v1559_v63 = vpop.eup %1558 }
 0x952   : > { %v991_v0 = vmul.f32 %v1559_v63, %v986_v62  ;;  %vm996_vm5 = vweird.f32 %v1559_v63  ;;  %v872_v8 = vpop.xlane.xlu2 %871 }
 0x953   : > { %v989_v1 = vpop.xlane.xlu1 %988  ;;  %vm997_vm7 = vmor %vm995_vm6, %vm996_vm5  ;;  %v898_v43 = vand.u32 2147483648, %v872_v8  ;;  %vm892_vm6 = vweird.f32 %v872_v8  ;;  %v896_v46 = vand.u32 2147483647, %v872_v8 }
 0x954   : > { %v992_v2 = vsub.f32 1.0, %v991_v0  ;;  %1560 = vrcp.f32 %v989_v1  ;;  %v1015_v21 = vand.u32 2147483648, %v989_v1  ;;  %v1013_v23 = vand.u32 2147483647, %v989_v1 }
 0x955   : > { %1562 = vrcp.f32 %v872_v8  ;;  %vm1009_vm11 = vweird.f32 %v989_v1  ;;  %v899_v48 = vor.u32 1.1754944e-38, %v898_v43 }
 0x956   : > { %v993_v4 = vmul.f32 %v1559_v63, %v992_v2  ;;  %v1016_v28 = vor.u32 1.1754944e-38, %v1015_v21  ;;  %vm1014_vm13 = vcmp.eq.f32.partialorder %v1013_v23, 8.507059e+37  ;;  %v1153_v23 = vld [vmem:[#allocation11 + $0x28] sm:$0xff] }
 0x958   : > { %v994_v6 = vadd.f32 %v1559_v63, %v993_v4 }
 0x95a   : > { %v1561_v12 = vpop.eup %1560  ;;  %v998_v13 = vsel %vm997_vm7, %v1559_v63, %v994_v6  ;;  %v2123_v63 = vld [vmem:[%s2195_s7 + $0x8] sm:$0x7f] }
 0x95b   : > { %v1003_v15 = vsel %vm1000_vm8, %v1002_v11, %v998_v13  ;;  %v1005_v16 = vmul.f32 %v1561_v12, %v989_v1  ;;  %v869_v17 = vpop.xlane.xlu1 %868  ;;  %vm1010_vm9 = vweird.f32 %v1561_v12  ;;  %v1563_v24 = vpop.eup %1562  ;;  %vm897_vm8 = vcmp.eq.f32.partialorder %v896_v46, 8.507059e+37 }
 0x95c   : > { %1564 = vrcp.f32 %v869_v17  ;;  %v1018_v20 = vmul.f32 %v1551_v50, %v1003_v15  ;;  %vm1011_vm12 = vmor %vm1009_vm11, %vm1010_vm9  ;;  %v888_v9 = vmul.f32 %v1563_v24, %v872_v8  ;;  %v884_v36 = vand.u32 2147483648, %v869_v17 }
 0x95d   : > { %v1006_v18 = vsub.f32 1.0, %v1005_v16  ;;  %v1021_v19 = vpop.permute.xlu0 %1020  ;;  %vm878_vm15 = vweird.f32 %v869_v17  ;;  %v882_v37 = vand.u32 2147483647, %v869_v17  ;;  %vm893_vm5 = vweird.f32 %v1563_v24 }
 0x95e   : > { %1044 = vmatpush.msrb.mxu0 %v1021_v19  ;;  %v889_v34 = vsub.f32 1.0, %v888_v9  ;;  %v885_v40 = vor.u32 1.1754944e-38, %v884_v36  ;;  %vm894_vm7 = vmor %vm892_vm6, %vm893_vm5  ;;  %v1069_v0 = vperm.slane %v2123_v63, 1  ;;  %v1148_v36 = vperm.slane %v2123_v63, 4 }
 0x95f   : > { %v1007_v22 = vmul.f32 %v1561_v12, %v1006_v18  ;;  %1413 = vmatmul.msk.f32.vlgmr.msrb.gmra.mxu0 %vm854_vm4, %v1018_v20  ;;  %vm883_vm3 = vcmp.eq.f32.partialorder %v882_v37, 8.507059e+37 }
 0x960   : > { %v890_v38 = vmul.f32 %v1563_v24, %v889_v34 }
 0x961   : > { %v1008_v25 = vadd.f32 %v1561_v12, %v1007_v22  ;;  %v1154_v22 = vld [vmem:[#allocation11 + $0x30] sm:$0xff] }
 0x962   : > { %v1565_v27 = vpop.eup %1564  ;;  %v891_v42 = vadd.f32 %v1563_v24, %v890_v38 }
 0x963   : > { %v874_v29 = vmul.f32 %v1565_v27, %v869_v17  ;;  %v1012_v14 = vsel %vm1011_vm12, %v1561_v12, %v1008_v25  ;;  %vm879_vm14 = vweird.f32 %v1565_v27 }
 0x964   : > { %v1017_v30 = vsel %vm1014_vm13, %v1016_v28, %v1012_v14  ;;  %vm880_vm2 = vmor %vm878_vm15, %vm879_vm14  ;;  %v895_v47 = vsel %vm894_vm7, %v1563_v24, %v891_v42  ;;  %v1152_v24 = vld [vmem:[#allocation11 + $0x20] sm:$0xff] }
 0x965   : > { %v875_v31 = vsub.f32 1.0, %v874_v29  ;;  %v1019_v32 = vmul.f32 %v1555_v57, %v1017_v30  ;;  %v900_v49 = vsel %vm897_vm8, %v899_v48, %v895_v47  ;;  %v1067_v57 = vld [vmem:[#allocation9 + $0x30] sm:$0xff] }
 0x966   : > { %v902_v50 = vmul.f32 %v2095_v56, %v900_v49  ;;  %1089 = vmatpush.msrb.mxu2 %v1067_v57  ;;  %v1065_v56 = vld [vmem:[#allocation9 + $0x20] sm:$0xff] }
 0x967   : > { %v876_v33 = vmul.f32 %v1565_v27, %v875_v31  ;;  %1414 = vmatmul.msk.f32.gmra.mxu0 %vm854_vm4, %v1019_v32 }
 0x968   : > { %1090 = vmatpush.msrb.mxu2 %v1066_v58 }
 0x969   : > { %v877_v35 = vadd.f32 %v1565_v27, %v876_v33  ;;  %v1145_v33 = vperm.slane %v2123_v63, 3 }
 0x96a   : > { %1091 = vmatpush.msrb.mxu2 %v1065_v56 }
 0x96b   : > { %v881_v39 = vsel %vm880_vm2, %v1565_v27, %v877_v35 }
 0x96c   : > { %v886_v41 = vsel %vm883_vm3, %v885_v40, %v881_v39 }
 0x96d   : > { %v901_v45 = vmul.f32 %v2100_v60, %v886_v41 }
 0x973   : > { %v904_v44 = vpop.permute.xlu1 %903 }
 0x974   : > { %927 = vmatpush.msra.mxu3 %v904_v44 }
 0x975   : > { %1408 = vmatmul.msk.f32.vlgmr.msra.gmra.mxu3 %vm854_vm4, %v901_v45 }
 0x97d   : > { %1409 = vmatmul.msk.f32.gmra.mxu3 %vm854_vm4, %v902_v50 }
 0x9dc   : > { %v1046_v51 = vpop.f32.mrf.mxu0 }
 0x9dd   : > { %1054 = vrot.lane.b32.xlu2 %v1046_v51, %s1809_s19 }
 0x9e4   : > { %v1049_v52 = vpop.f32.mrf.mxu0 }
 0x9e5   : > { %1056 = vrot.lane.b32.xlu0 %v1049_v52, %s1809_s19  ;;  %v1156_v52 = vperm.slane %v2123_v63, 2  ;;  %s1255_s19 = sshll.u32 %s391_s10, 4  ;;  %s1256_s19 = int_to_ptr.vmem [resolvable:$true] %s1255_s19 }
 0x9f8   : > { %v929_v53 = vpop.f32.mrf.mxu3 }
 0x9f9   : > { %935 = vst.msk [vmem:[#allocation2] sm:$0xff] %vm463_vm1, %v929_v53 }
 0xa00   : > { %v932_v54 = vpop.f32.mrf.mxu3 }
 0xa01   : > { %936 = vst.msk [vmem:[#allocation2 + $0x8] sm:$0xff] %vm463_vm1, %v932_v54 }
 0xa37   : > { %v1055_v59 = vpop.permute.xlu2 %1054 }
 0xa38   : > { %1060 = vst.msk [vmem:[#allocation2] sm:$0xff] %vm636_vm10, %v1055_v59 }
 0xa3f   : > { %v1062_v60 = vld [vmem:[#allocation2] sm:$0xff] }
 0xa40   : > { %1415 = vmatmul.msk.f32.vlgmr.msrb.gmra.mxu2 %vm401_vm0, %v1062_v60 }
 0xa57   : > { %v1057_v61 = vpop.permute.xlu0 %1056 }
 0xa58   : > { %1061 = vst.msk [vmem:[#allocation2 + $0x8] sm:$0xff] %vm636_vm10, %v1057_v61 }
 0xa5f   : > { %v1063_v62 = vld [vmem:[#allocation2 + $0x8] sm:$0xff] }
 0xa60   : > { %1416 = vmatmul.msk.f32.gmra.mxu2 %vm401_vm0, %v1063_v62 }
 0xac3   : > { %v1093_v1 = vpop.f32.mrf.mxu2 }
 0xac4   : > { %v1094_v2 = vadd.f32 %v1093_v1, %v1069_v0 }
 0xac6   : > { %v1099_v3 = vadd.f32 %v1094_v2, %v2005_v7 }
 0xac8   : > { %v1101_v4 = vsel %vm401_vm0, %v1099_v3, 0.0 }
 0xac9   : > { %1102 = vadd.xlane.f32.xlu0 %v1101_v4 }
 0xae3   : > { %v1096_v5 = vpop.f32.mrf.mxu2 }
 0xae4   : > { %v1097_v6 = vadd.f32 %v1096_v5, %v1069_v0 }
 0xae6   : > { %v1100_v8 = vadd.f32 %v1097_v6, %v2016_v10  ;;  %v1155_v10 = vld [vmem:[#allocation11 + $0x38] sm:$0xff] }
 0xae7   : > { %1175 = vmatpush.msrb.mxu3 %v1155_v10  ;;  %v1234_v10 = vperm.slane %v2123_v63, 5 }
 0xae8   : > { %v1104_v11 = vsel %vm401_vm0, %v1100_v8, 0.0 }
 0xae9   : > { %1105 = vadd.xlane.f32.xlu1 %v1104_v11  ;;  %1176 = vmatpush.msrb.mxu3 %v1154_v22 }
 0xaeb   : > { %1177 = vmatpush.msrb.mxu3 %v1153_v23  ;;  %v1237_v23 = vperm.slane %v2123_v63, 6 }
 0xaed   : > { %1178 = vmatpush.msrb.mxu3 %v1152_v24 }
 0xb3c   : > { %v1103_v12 = vpop.xlane.xlu0 %1102 }
 0xb3d   : > { %v1107_v13 = vmul.f32 %v1103_v12, %v2055_v26 }
 0xb3f   : > { %v1109_v15 = vsub.f32 %v1099_v3, %v1107_v13 }
 0xb41   : > { %v1111_v16 = vmul.f32 %v1109_v15, %v1109_v15 }
 0xb43   : > { %v1113_v17 = vsel %vm401_vm0, %v1111_v16, 0.0 }
 0xb44   : > { %1114 = vadd.xlane.f32.xlu2 %v1113_v17 }
 0xb5c   : > { %v1106_v18 = vpop.xlane.xlu1 %1105 }
 0xb5d   : > { %v1108_v7 = vmul.f32 %v1106_v18, %v2055_v26 }
 0xb5f   : > { %v1110_v19 = vsub.f32 %v1100_v8, %v1108_v7 }
 0xb61   : > { %v1112_v20 = vmul.f32 %v1110_v19, %v1110_v19 }
 0xb63   : > { %v1116_v21 = vsel %vm401_vm0, %v1112_v20, 0.0 }
 0xb64   : > { %1117 = vadd.xlane.f32.xlu0 %v1116_v21 }
 0xbb7   : > { %v1115_v25 = vpop.xlane.xlu2 %1114 }
 0xbb8   : > { %v1119_v27 = vmul.f32 %v1115_v25, %v2055_v26 }
 0xbba   : > { %v1121_v28 = vadd.f32 1e-05, %v1119_v27 }
 0xbbc   : > { %1566 = vrsqrt.f32 %v1121_v28  ;;  %vm1129_vm10 = vweird.f32 %v1121_v28 }
 0xbc2   : > { %v1567_v29 = vpop.eup %1566 }
 0xbc3   : > { %v1124_v14 = vmul.f32 %v1567_v29, %v1121_v28  ;;  %vm1130_vm1 = vweird.f32 %v1567_v29 }
 0xbc4   : > { %vm1131_vm4 = vmor %vm1129_vm10, %vm1130_vm1 }
 0xbc5   : > { %v1125_v30 = vmul.f32 %v1567_v29, %v1124_v14 }
 0xbc7   : > { %v1126_v9 = vmul.f32 0.5, %v1125_v30 }
 0xbc9   : > { %v1127_v31 = vsub.f32 1.5, %v1126_v9 }
 0xbcb   : > { %v1128_v32 = vmul.f32 %v1567_v29, %v1127_v31 }
 0xbcd   : > { %v1132_v34 = vsel %vm1131_vm4, %v1567_v29, %v1128_v32 }
 0xbce   : > { %v1143_v35 = vmul.f32 %v1132_v34, %v1109_v15 }
 0xbd0   : > { %v1146_v37 = vmul.f32 %v1145_v33, %v1143_v35 }
 0xbd2   : > { %v1149_v38 = vadd.f32 %v1148_v36, %v1146_v37 }
 0xbd4   : > { %1417 = vmatmul.msk.f32.vlgmr.msrb.gmra.mxu3 %vm401_vm0, %v1149_v38 }
 0xbd7   : > { %v1118_v39 = vpop.xlane.xlu0 %1117 }
 0xbd8   : > { %v1120_v40 = vmul.f32 %v1118_v39, %v2055_v26 }
 0xbda   : > { %v1122_v41 = vadd.f32 1e-05, %v1120_v40 }
 0xbdc   : > { %1568 = vrsqrt.f32 %v1122_v41  ;;  %vm1139_vm11 = vweird.f32 %v1122_v41 }
 0xbe2   : > { %v1569_v42 = vpop.eup %1568 }
 0xbe3   : > { %v1134_v43 = vmul.f32 %v1569_v42, %v1122_v41  ;;  %vm1140_vm9 = vweird.f32 %v1569_v42 }
 0xbe4   : > { %vm1141_vm12 = vmor %vm1139_vm11, %vm1140_vm9 }
 0xbe5   : > { %v1135_v44 = vmul.f32 %v1569_v42, %v1134_v43 }
 0xbe7   : > { %v1136_v45 = vmul.f32 0.5, %v1135_v44 }
 0xbe9   : > { %v1137_v46 = vsub.f32 1.5, %v1136_v45 }
 0xbeb   : > { %v1138_v47 = vmul.f32 %v1569_v42, %v1137_v46 }
 0xbed   : > { %v1142_v48 = vsel %vm1141_vm12, %v1569_v42, %v1138_v47 }
 0xbee   : > { %v1144_v49 = vmul.f32 %v1142_v48, %v1110_v19 }
 0xbf0   : > { %v1147_v50 = vmul.f32 %v1145_v33, %v1144_v49 }
 0xbf2   : > { %v1150_v51 = vadd.f32 %v1148_v36, %v1147_v50 }
 0xbf4   : > { %1418 = vmatmul.msk.f32.gmra.mxu3 %vm401_vm0, %v1150_v51 }
 0xc57   : > { %v1180_v53 = vpop.f32.mrf.mxu3 }
 0xc58   : > { %v1181_v54 = vadd.f32 %v1180_v53, %v1156_v52 }
 0xc5a   : > { %v1186_v55 = vmax.f32 %v1181_v54, 0.0 }
 0xc5c   : > { %v1188_v57 = vadd.f32 %v1186_v55, %v1149_v38 }
 0xc5e   : > { %v1190_v58 = vsel %vm401_vm0, %v1188_v57, 0.0 }
 0xc5f   : > { %1191 = vadd.xlane.f32.xlu0 %v1190_v58 }
 0xc77   : > { %v1183_v56 = vpop.f32.mrf.mxu3 }
 0xc78   : > { %v1184_v59 = vadd.f32 %v1183_v56, %v1156_v52 }
 0xc7a   : > { %v1187_v60 = vmax.f32 %v1184_v59, 0.0 }
 0xc7c   : > { %v1189_v61 = vadd.f32 %v1187_v60, %v1150_v51 }
 0xc7e   : > { %v1193_v62 = vsel %vm401_vm0, %v1189_v61, 0.0 }
 0xc7f   : > { %1194 = vadd.xlane.f32.xlu1 %v1193_v62 }
 0xcd2   : > { %v1192_v0 = vpop.xlane.xlu0 %1191 }
 0xcd3   : > { %v1196_v1 = vmul.f32 %v1192_v0, %v2055_v26 }
 0xcd5   : > { %v1198_v2 = vsub.f32 %v1188_v57, %v1196_v1 }
 0xcd7   : > { %v1200_v3 = vmul.f32 %v1198_v2, %v1198_v2 }
 0xcd9   : > { %v1202_v4 = vsel %vm401_vm0, %v1200_v3, 0.0 }
 0xcda   : > { %1203 = vadd.xlane.f32.xlu2 %v1202_v4 }
 0xcf2   : > { %v1195_v5 = vpop.xlane.xlu1 %1194 }
 0xcf3   : > { %v1197_v6 = vmul.f32 %v1195_v5, %v2055_v26 }
 0xcf5   : > { %v1199_v8 = vsub.f32 %v1189_v61, %v1197_v6 }
 0xcf7   : > { %v1201_v11 = vmul.f32 %v1199_v8, %v1199_v8 }
 0xcf9   : > { %v1205_v12 = vsel %vm401_vm0, %v1201_v11, 0.0 }
 0xcfa   : > { %1206 = vadd.xlane.f32.xlu0 %v1205_v12 }
 0xd4d   : > { %v1204_v13 = vpop.xlane.xlu2 %1203 }
 0xd4e   : > { %v1208_v15 = vmul.f32 %v1204_v13, %v2055_v26 }
 0xd50   : > { %v1210_v16 = vadd.f32 1e-05, %v1208_v15 }
 0xd52   : > { %1570 = vrsqrt.f32 %v1210_v16  ;;  %vm1218_vm14 = vweird.f32 %v1210_v16 }
 0xd58   : > { %v1571_v17 = vpop.eup %1570 }
 0xd59   : > { %v1213_v18 = vmul.f32 %v1571_v17, %v1210_v16  ;;  %vm1219_vm13 = vweird.f32 %v1571_v17 }
 0xd5a   : > { %vm1220_vm15 = vmor %vm1218_vm14, %vm1219_vm13 }
 0xd5b   : > { %v1214_v7 = vmul.f32 %v1571_v17, %v1213_v18 }
 0xd5d   : > { %v1215_v19 = vmul.f32 0.5, %v1214_v7 }
 0xd5f   : > { %v1216_v20 = vsub.f32 1.5, %v1215_v19 }
 0xd61   : > { %v1217_v21 = vmul.f32 %v1571_v17, %v1216_v20 }
 0xd63   : > { %v1221_v22 = vsel %vm1220_vm15, %v1571_v17, %v1217_v21 }
 0xd64   : > { %v1232_v24 = vmul.f32 %v1221_v22, %v1198_v2 }
 0xd66   : > { %v1235_v25 = vmul.f32 %v1234_v10, %v1232_v24 }
 0xd68   : > { %v1238_v27 = vadd.f32 %v1237_v23, %v1235_v25 }
 0xd6a   : > { %1240 = vst.msk [vmem:[%s391_s10] sm:$0xff] %vm401_vm0, %v1238_v27 }
 0xd6d   : > { %v1207_v28 = vpop.xlane.xlu0 %1206 }
 0xd6e   : > { %v1209_v29 = vmul.f32 %v1207_v28, %v2055_v26 }
 0xd70   : > { %v1211_v14 = vadd.f32 1e-05, %v1209_v29 }
 0xd72   : > { %1572 = vrsqrt.f32 %v1211_v14  ;;  %vm1228_vm3 = vweird.f32 %v1211_v14 }
 0xd78   : > { %v1573_v30 = vpop.eup %1572 }
 0xd79   : > { %v1223_v9 = vmul.f32 %v1573_v30, %v1211_v14  ;;  %vm1229_vm2 = vweird.f32 %v1573_v30 }
 0xd7a   : > { %vm1230_vm5 = vmor %vm1228_vm3, %vm1229_vm2 }
 0xd7b   : > { %v1224_v31 = vmul.f32 %v1573_v30, %v1223_v9 }
 0xd7d   : > { %v1225_v32 = vmul.f32 0.5, %v1224_v31 }
 0xd7f   : > { %v1226_v33 = vsub.f32 1.5, %v1225_v32 }
 0xd81   : > { %v1227_v63 = vmul.f32 %v1573_v30, %v1226_v33 }
 0xd83   : > { %v1231_v34 = vsel %vm1230_vm5, %v1573_v30, %v1227_v63 }
 0xd84   : > { %v1233_v26 = vmul.f32 %v1231_v34, %v1199_v8 }
 0xd86   : > { %v1236_v35 = vmul.f32 %v1234_v10, %v1233_v26 }
 0xd88   : > { %v1239_v36 = vadd.f32 %v1237_v23, %v1236_v35 }
 0xd8a   : > { %1241 = vst.msk [vmem:[%s391_s10 + $0x8] sm:$0xff] %vm401_vm0, %v1239_v36 }
 0xd8b   : > { %1751 = shalt.err (!%p1748_p10)
}
 0xd8c   : > { %s1811_s18 = smov 128   ;;  %s1812_s10 = smov 8  }
 0xd8d   : > { %1444 = dma.vmem_to_hbm [thread:$0]  (%p1954_p3), %s1256_s19, 256, %s1258_s22, %s1243_s9, %s1811_s18, %s1811_s18, %s1812_s10  }
 0xd8e PF: > { %s1272_s20 = sand.u32 1, %s1786_s27   ;;  %p2211_p12 = scmp.ge.s32.totalorder %s1798_s30, 2 }
 0xd8f   : > { %s1273_s21 = scalar_lea.sflag [#allocation5], %s1272_s20 }
 0xd90   : > { %p1464_p13 = pnand %p2211_p12, %p1893_p6 }
 0xd92   : > { %p1465_p0 = pneg %p1464_p13 }
 0xd94   : > { %1781 = dma.done.wait (%p1465_p0), %s1273_s21, 256  }
 0xd95   : > { %1783 = vsyncadd (%p1465_p0), %s1273_s21, 4294967040  ;;  %p23_p5 = scmp.ge.s32.totalorder %s1944_s26, 4   ;;  %s2212_s27 = smov %s1790_s28 }
 0xd96   : > { %s2213_s28 = smov %s1794_s29  ;;  %s2214_s29 = smov %s1960_s15 }
 0xd97   : > { %s2215_s30 = smov %s1944_s26  ;;  %25 = sbr.rel (!%p23_p5) target bundleno = 10 (0xa), region = 119 }
 0xd9c   :  { %1279 = vsyncpa [#allocation4], 1 }
 0xd9d   :  { %1281 = vsyncpa [#allocation4 + $0x1], 1 }
 0xd9e   :  { %1282 = vsyncpa [#allocation7], 1 }
 0xd9f   :  { %1283 = vsyncpa [#allocation10], 1 }
 0xda0   :  { %1284 = vsyncpa [#allocation5], 1 }
 0xda1   :  { %1286 = vsyncpa [#allocation5 + $0x1], 1 }

</bundles_post_ra>
